<compile_context>
chip_gen: v5e
topology: v5e:2x2
jax: 0.10.0
libtpu: 0.0.40
codegen_flags: <defaults>
</compile_context>

<pallas_src>
import functools

import jax
import jax.numpy as jnp
from jax import lax
from jax.experimental import pallas as pl
from jax.experimental.pallas import tpu as pltpu

# ---------------- synthetic config (small, Mistral-shaped, lane-dense) -------
HIDDEN = 128
NUM_HEADS = 4
NUM_KV_HEADS = 2
HEAD_SIZE = HIDDEN // NUM_HEADS             # 32
INTERMEDIATE = 256
SEQ = 16
NUM_LAYERS = 2
VOCAB = 256
RMS_EPS = 1e-6
ROPE_THETA = 10000.0
SLIDING_WINDOW = None                        # config.sliding_window
MAX_PAST = SLIDING_WINDOW if SLIDING_WINDOW is not None else -1
NUM_GROUPS = NUM_HEADS // NUM_KV_HEADS
SOFTMAX_SCALE = HEAD_SIZE ** (-0.5)
Q_SIZE = NUM_HEADS * HEAD_SIZE               # 128
KV_SIZE = NUM_KV_HEADS * HEAD_SIZE           # 64
QKV_OUT = Q_SIZE + 2 * KV_SIZE               # 256
DTYPE = jnp.bfloat16                         # model dtype (weights/activations)


# ---------------- in-kernel helpers ----------------
def _rmsnorm_f32(x, w, eps):
    var = jnp.mean(x * x, axis=-1, keepdims=True)
    return x * lax.rsqrt(var + eps) * w


def _silu_f32(x):
    # Mistral hidden_act = "silu"; written with basic ops for robust lowering.
    return x * (1.0 / (1.0 + jnp.exp(-x)))


def _rope_roll(x, cos, sin_signed, head_size):
    """GPT-NeoX rotary applied to a [T, n_heads*head_size] lane-dense block.

    cos / sin_signed are tiled per head by the wrapper; sin_signed already
    carries the -sin / +sin sign of rotate-half (and zeros/ones on columns
    that must pass through unchanged).  rotate_half is built from two XLU
    lane rotations selected per lane position -> no 16-lane slices, no lane
    concatenation.
    """
    width = x.shape[-1]
    half = head_size // 2
    lane = lax.broadcasted_iota(jnp.int32, x.shape, 1)
    first_half = (lane % head_size) < half
    fwd = pltpu.roll(x, width - half, axis=1)    # fwd[:, j] == x[:, j + half]
    bwd = pltpu.roll(x, half, axis=1)            # bwd[:, j] == x[:, j - half]
    rotated = jnp.where(first_half, fwd, bwd)
    return x * cos + rotated * sin_signed


# ---------------- fused whole-model kernel (grid over layers) ----------------
def _mistral_stack_kernel(hidden_ref, cosq_ref, sinq_ref, coskv_ref, sinkv_ref,
                          norm_w_ref, ln1_ref, wqkv_ref, wo_ref, ln2_ref,
                          wgu_ref, wd_ref,
                          out_ref, stream_ref, *,
                          num_heads, num_kv_heads, head_size, inter, eps,
                          softmax_scale, max_past):
    layer = pl.program_id(0)
    T = hidden_ref.shape[0]
    groups = num_heads // num_kv_heads
    q_size = num_heads * head_size
    kv_size = num_kv_heads * head_size

    # Layer 0: residual is None in the reference, so the stream is just the
    # embeddings (no zeros buffer, no extra add).
    @pl.when(layer == 0)
    def _():
        stream_ref[...] = hidden_ref[...].astype(jnp.float32)

    # f32-resident residual stream == (hidden + residual) of the reference.
    x = stream_ref[...]

    # ---- input_layernorm (RMSNorm in f32) ----
    normed1 = _rmsnorm_f32(x, ln1_ref[0].astype(jnp.float32), eps)

    # ---- fused QKV projection (bf16 MXU operands, f32 accumulation) ----
    qkv = jnp.dot(normed1.astype(wqkv_ref.dtype), wqkv_ref[0],
                  preferred_element_type=jnp.float32)        # [T, QKV_OUT]

    # ---- RoPE on the two 128-wide, lane-aligned blocks.
    # Block A = all Q heads; block B = [K heads | V heads], where the V
    # columns get cos=1 / sin=0 multipliers (identity).
    q_flat = _rope_roll(qkv[:, :q_size], cosq_ref[...], sinq_ref[...], head_size)
    kv_flat = _rope_roll(qkv[:, q_size:], coskv_ref[...], sinkv_ref[...], head_size)

    # ---- head-major stacking along the LEADING axis (no lane concat) ----
    q3 = jnp.stack([q_flat[:, h * head_size:(h + 1) * head_size]
                    for h in range(num_heads)], axis=0)               # [NH, T, D]
    k3 = jnp.stack([kv_flat[:, kv * head_size:(kv + 1) * head_size]
                    for kv in range(num_kv_heads)], axis=0)           # [NKV, T, D]
    v3 = jnp.stack([kv_flat[:, kv_size + kv * head_size:
                            kv_size + (kv + 1) * head_size]
                    for kv in range(num_kv_heads)], axis=0)           # [NKV, T, D]
    # GQA: expand each KV head across its query group (leading-dim broadcast
    # + leading-dim reshape only; rope(K) computed once per KV head above).
    k_e = jnp.broadcast_to(k3[:, None], (num_kv_heads, groups, T, head_size)
                           ).reshape(num_heads, T, head_size)
    v_e = jnp.broadcast_to(v3[:, None], (num_kv_heads, groups, T, head_size)
                           ).reshape(num_heads, T, head_size)

    # ---- batched causal attention over all heads (3-D einsums on the MXU) ----
    s = jnp.einsum('htd,hsd->hts',
                   q3.astype(jnp.bfloat16), k_e.astype(jnp.bfloat16),
                   preferred_element_type=jnp.float32) * softmax_scale
    qi = lax.broadcasted_iota(jnp.int32, (T, T), 0)
    ki = lax.broadcasted_iota(jnp.int32, (T, T), 1)
    mask = ki <= qi
    if max_past > 0:
        # flash-attn window_size_left semantics.
        # TODO(synk): verify inclusive/exclusive boundary against TGI flash_attn
        # before enabling SLIDING_WINDOW.
        mask = jnp.logical_and(mask, (qi - ki) <= max_past)
    s = jnp.where(mask[None], s, -1e30)
    m = jnp.max(s, axis=-1, keepdims=True)
    p = jnp.exp(s - m)
    denom = jnp.sum(p, axis=-1, keepdims=True)
    o3 = jnp.einsum('hts,hsd->htd',
                    p.astype(jnp.bfloat16), v_e.astype(jnp.bfloat16),
                    preferred_element_type=jnp.float32)               # [NH, T, D]
    o3 = o3 * pl.reciprocal(denom, approx=True)                       # EUP slot

    # ---- o_proj folded per head (wo pre-shaped [NH, D, H]); f32 reduce;
    #      no lane-axis concatenation of head outputs. ----
    partial = jnp.einsum('htd,hde->hte',
                         o3.astype(jnp.bfloat16), wo_ref[0],
                         preferred_element_type=jnp.float32)          # [NH, T, H]
    attn_res = jnp.sum(partial, axis=0) + x                           # + residual

    # ---- post_attention_layernorm + MLP (gate/up fused, SiLU, down) ----
    normed2 = _rmsnorm_f32(attn_res, ln2_ref[0].astype(jnp.float32), eps)
    gu = jnp.dot(normed2.astype(wgu_ref.dtype), wgu_ref[0],
                 preferred_element_type=jnp.float32)                  # [T, 2I]
    h_act = _silu_f32(gu[:, :inter]) * gu[:, inter:]
    mlp_out = jnp.dot(h_act.astype(wd_ref.dtype), wd_ref[0],
                      preferred_element_type=jnp.float32)             # [T, H]

    new_stream = mlp_out + attn_res
    stream_ref[...] = new_stream

    # ---- final model.norm folded into the last layer step ----
    @pl.when(layer == pl.num_programs(0) - 1)
    def _():
        out_ref[...] = _rmsnorm_f32(
            new_stream, norm_w_ref[...].astype(jnp.float32), eps
        ).astype(out_ref.dtype)


# ---------------- MistralModel forward (prefill path) ----------------
def mistral_model_forward(params, input_ids, position_ids):
    # embed_tokens (plain-JAX gather; not worth a kernel at this size)
    hidden = jnp.take(params["embed_tokens"], input_ids, axis=0)      # [T, H]
    T = hidden.shape[0]

    # Rotary tables (rotary_dim = HEAD_SIZE), tiled per head so the kernel can
    # apply rope on full 128-wide blocks with pltpu.roll:
    #   cos_q / sin_q  : [T, Q_SIZE]   (all query heads)
    #   cos_kv / sin_kv: [T, 2*KV_SIZE] (K heads roped, V columns identity)
    inv_freq = 1.0 / (ROPE_THETA ** (
        jnp.arange(0, HEAD_SIZE, 2, dtype=jnp.float32) / HEAD_SIZE))
    freqs = position_ids.astype(jnp.float32)[:, None] * inv_freq[None, :]  # [T, D/2]
    cos_h = jnp.concatenate([jnp.cos(freqs), jnp.cos(freqs)], axis=-1)     # [T, D]
    sin_h = jnp.concatenate([-jnp.sin(freqs), jnp.sin(freqs)], axis=-1)    # signed
    cos_q = jnp.tile(cos_h, (1, NUM_HEADS))
    sin_q = jnp.tile(sin_h, (1, NUM_HEADS))
    cos_kv = jnp.concatenate([jnp.tile(cos_h, (1, NUM_KV_HEADS)),
                              jnp.ones((T, KV_SIZE), jnp.float32)], axis=-1)
    sin_kv = jnp.concatenate([jnp.tile(sin_h, (1, NUM_KV_HEADS)),
                              jnp.zeros((T, KV_SIZE), jnp.float32)], axis=-1)

    kernel = functools.partial(
        _mistral_stack_kernel,
        num_heads=NUM_HEADS, num_kv_heads=NUM_KV_HEADS, head_size=HEAD_SIZE,
        inter=INTERMEDIATE, eps=RMS_EPS, softmax_scale=SOFTMAX_SCALE,
        max_past=MAX_PAST)

    return pl.pallas_call(
        kernel,
        grid=(NUM_LAYERS,),
        out_shape=jax.ShapeDtypeStruct((T, HIDDEN), DTYPE),
        in_specs=[
            pl.BlockSpec((T, HIDDEN), lambda l: (0, 0)),                  # hidden
            pl.BlockSpec((T, Q_SIZE), lambda l: (0, 0)),                  # cos_q
            pl.BlockSpec((T, Q_SIZE), lambda l: (0, 0)),                  # sin_q
            pl.BlockSpec((T, 2 * KV_SIZE), lambda l: (0, 0)),             # cos_kv
            pl.BlockSpec((T, 2 * KV_SIZE), lambda l: (0, 0)),             # sin_kv
            pl.BlockSpec((1, HIDDEN), lambda l: (0, 0)),                  # norm_w
            pl.BlockSpec((1, 1, HIDDEN), lambda l: (l, 0, 0)),            # ln1_w
            pl.BlockSpec((1, HIDDEN, QKV_OUT), lambda l: (l, 0, 0)),      # wqkv
            pl.BlockSpec((1, NUM_HEADS, HEAD_SIZE, HIDDEN),
                         lambda l: (l, 0, 0, 0)),                         # wo
            pl.BlockSpec((1, 1, HIDDEN), lambda l: (l, 0, 0)),            # ln2_w
            pl.BlockSpec((1, HIDDEN, 2 * INTERMEDIATE), lambda l: (l, 0, 0)),
            pl.BlockSpec((1, INTERMEDIATE, HIDDEN), lambda l: (l, 0, 0)),
        ],
        out_specs=pl.BlockSpec((T, HIDDEN), lambda l: (0, 0)),
        scratch_shapes=[pltpu.VMEM((T, HIDDEN), jnp.float32)],
        compiler_params=pltpu.CompilerParams(
            dimension_semantics=("arbitrary",)),
    )(hidden, cos_q, sin_q, cos_kv, sin_kv,
      params["norm_w"], params["ln1_w"], params["wqkv"], params["wo"],
      params["ln2_w"], params["w_gate_up"], params["w_down"])


# ---------------- deterministic parameter init (layer-stacked) ----------------
def init_params(key):
    keys = jax.random.split(key, 1 + 4 * NUM_LAYERS)

    def w(k, shape, scale=0.05):
        return (scale * jax.random.normal(k, shape, jnp.float32)).astype(DTYPE)

    wqkv, wo, wgu, wd = [], [], [], []
    for l in range(NUM_LAYERS):
        ks = keys[1 + 4 * l: 1 + 4 * (l + 1)]
        # torch weights are [out, in]; store transposed [in, out] so y = x @ W.
        wqkv.append(w(ks[0], (QKV_OUT, HIDDEN)).T)                       # [H, QKV]
        wo.append(w(ks[1], (HIDDEN, Q_SIZE)).T
                  .reshape(NUM_HEADS, HEAD_SIZE, HIDDEN))                # [NH, D, H]
        wgu.append(w(ks[2], (2 * INTERMEDIATE, HIDDEN)).T)               # [H, 2I]
        wd.append(w(ks[3], (HIDDEN, INTERMEDIATE)).T)                    # [I, H]

    return {
        "embed_tokens": w(keys[0], (VOCAB, HIDDEN), scale=0.02),
        "norm_w": jnp.ones((1, HIDDEN), DTYPE),
        "ln1_w": jnp.ones((NUM_LAYERS, 1, HIDDEN), DTYPE),
        "ln2_w": jnp.ones((NUM_LAYERS, 1, HIDDEN), DTYPE),
        "wqkv": jnp.stack(wqkv),          # [L, H, QKV_OUT]
        "wo": jnp.stack(wo),              # [L, NH, D, H]
        "w_gate_up": jnp.stack(wgu),      # [L, H, 2I]
        "w_down": jnp.stack(wd),          # [L, I, H]
    }


if __name__ == "__main__":
    key = jax.random.PRNGKey(0)
    kp, ki = jax.random.split(key)
    params = init_params(kp)

    input_ids = jax.random.randint(ki, (SEQ,), 0, VOCAB, dtype=jnp.int32)
    position_ids = jnp.arange(SEQ, dtype=jnp.int32)

    out = jax.jit(mistral_model_forward)(params, input_ids, position_ids)
    jax.block_until_ready(out)
    assert out.shape == (SEQ, HIDDEN)
    assert bool(jnp.all(jnp.isfinite(out.astype(jnp.float32))))
    print("KERNEL_OK")
</pallas_src>

<mosaic_0001>
module attributes {stable_mosaic.version = 11 : i64} {
  func.func @_mistral_stack_kernel(%arg0: i32, %arg1: memref<16x128xbf16, #tpu.memory_space<vmem>>, %arg2: memref<16x128xf32, #tpu.memory_space<vmem>>, %arg3: memref<16x128xf32, #tpu.memory_space<vmem>>, %arg4: memref<16x128xf32, #tpu.memory_space<vmem>>, %arg5: memref<16x128xf32, #tpu.memory_space<vmem>>, %arg6: memref<1x128xbf16, #tpu.memory_space<vmem>>, %arg7: memref<1x1x128xbf16, #tpu.memory_space<vmem>>, %arg8: memref<1x128x256xbf16, #tpu.memory_space<vmem>>, %arg9: memref<1x4x32x128xbf16, #tpu.memory_space<vmem>>, %arg10: memref<1x1x128xbf16, #tpu.memory_space<vmem>>, %arg11: memref<1x128x512xbf16, #tpu.memory_space<vmem>>, %arg12: memref<1x256x128xbf16, #tpu.memory_space<vmem>>, %arg13: memref<16x128xbf16, #tpu.memory_space<vmem>>, %arg14: memref<16x128xf32, #tpu.memory_space<vmem>>) attributes {dimension_semantics = [#tpu.dimension_semantics<arbitrary>], iteration_bounds = array<i64: 2>, scalar_prefetch = 0 : i64, scratch_operands = 1 : i64, tpu.core_type = #tpu.core_type<tc>, window_params = [{pipeline_mode = #tpu.pipeline_mode<synchronous>, transform_indices = @transform_0, window_bounds = array<i64: 16, 128>}, {pipeline_mode = #tpu.pipeline_mode<synchronous>, transform_indices = @transform_1, window_bounds = array<i64: 16, 128>}, {pipeline_mode = #tpu.pipeline_mode<synchronous>, transform_indices = @transform_2, window_bounds = array<i64: 16, 128>}, {pipeline_mode = #tpu.pipeline_mode<synchronous>, transform_indices = @transform_3, window_bounds = array<i64: 16, 128>}, {pipeline_mode = #tpu.pipeline_mode<synchronous>, transform_indices = @transform_4, window_bounds = array<i64: 16, 128>}, {pipeline_mode = #tpu.pipeline_mode<synchronous>, transform_indices = @transform_5, window_bounds = array<i64: 1, 128>}, {transform_indices = @transform_6, window_bounds = array<i64: 1, 1, 128>}, {transform_indices = @transform_7, window_bounds = array<i64: 1, 128, 256>}, {transform_indices = @transform_8, window_bounds = array<i64: 1, 4, 32, 128>}, {transform_indices = @transform_9, window_bounds = array<i64: 1, 1, 128>}, {transform_indices = @transform_10, window_bounds = array<i64: 1, 128, 512>}, {transform_indices = @transform_11, window_bounds = array<i64: 1, 256, 128>}, {pipeline_mode = #tpu.pipeline_mode<synchronous>, transform_indices = @transform_12, window_bounds = array<i64: 16, 128>}]} {
    %c0_i32 = arith.constant 0 : i32
    %0 = arith.cmpi eq, %arg0, %c0_i32 : i32
    %1 = arith.extui %0 : i1 to i32
    %c0_i32_0 = arith.constant 0 : i32
    %2 = arith.cmpi ne, %1, %c0_i32_0 : i32
    scf.if %2 {
      %c0_66 = arith.constant 0 : index
      %c0_67 = arith.constant 0 : index
      %177 = vector.load %arg1[%c0_66, %c0_67] : memref<16x128xbf16, #tpu.memory_space<vmem>>, vector<16x128xbf16>
      %178 = arith.extf %177 : vector<16x128xbf16> to vector<16x128xf32>
      %c0_68 = arith.constant 0 : index
      %c0_69 = arith.constant 0 : index
      %179 = vector.load %arg14[%c0_68, %c0_69] : memref<16x128xf32, #tpu.memory_space<vmem>>, vector<16x128xf32>
      tpu.vector_store %arg14[%c0_68, %c0_69], %178 {strides = array<i32>} : memref<16x128xf32, #tpu.memory_space<vmem>>, vector<16x128xf32>,
    } else {
    }
    %c0 = arith.constant 0 : index
    %c0_1 = arith.constant 0 : index
    %3 = vector.load %arg14[%c0, %c0_1] : memref<16x128xf32, #tpu.memory_space<vmem>>, vector<16x128xf32>
    %c0_2 = arith.constant 0 : index
    %c0_3 = arith.constant 0 : index
    %c0_4 = arith.constant 0 : index
    %4 = vector.load %arg7[%c0_2, %c0_3, %c0_4] : memref<1x1x128xbf16, #tpu.memory_space<vmem>>, vector<1x1x128xbf16>
    %5 = vector.shape_cast %4 : vector<1x1x128xbf16> to vector<1x128xbf16>
    %6 = arith.extf %5 : vector<1x128xbf16> to vector<1x128xf32>
    %7 = arith.mulf %3, %3 : vector<16x128xf32>
    %cst = arith.constant dense<0.000000e+00> : vector<16xf32>
    %8 = vector.multi_reduction <add>, %7, %cst [1] : vector<16x128xf32> to vector<16xf32>
    %9 = vector.shape_cast %8 : vector<16xf32> to vector<16x1xf32>
    %cst_5 = arith.constant 1.280000e+02 : f32
    %10 = vector.broadcast %cst_5 : f32 to vector<16x1xf32>
    %11 = arith.divf %9, %10 : vector<16x1xf32>
    %cst_6 = arith.constant 9.99999997E-7 : f32
    %12 = vector.broadcast %cst_6 : f32 to vector<16x1xf32>
    %13 = arith.addf %11, %12 : vector<16x1xf32>
    %14 = math.rsqrt %13 : vector<16x1xf32>
    %15 = vector.broadcast %14 : vector<16x1xf32> to vector<16x128xf32>
    %16 = arith.mulf %3, %15 : vector<16x128xf32>
    %17 = vector.broadcast %6 : vector<1x128xf32> to vector<16x128xf32>
    %18 = arith.mulf %16, %17 : vector<16x128xf32>
    %19 = arith.truncf %18 : vector<16x128xf32> to vector<16x128xbf16>
    %c0_7 = arith.constant 0 : index
    %c0_8 = arith.constant 0 : index
    %c0_9 = arith.constant 0 : index
    %20 = vector.load %arg8[%c0_7, %c0_8, %c0_9] : memref<1x128x256xbf16, #tpu.memory_space<vmem>>, vector<1x128x256xbf16>
    %21 = vector.shape_cast %20 : vector<1x128x256xbf16> to vector<128x256xbf16>
    %cst_10 = arith.constant dense<0.000000e+00> : vector<16x256xf32>
    %22 = tpu.matmul %19, %21, %cst_10 {dimension_numbers = #tpu.dot_dimension_numbers<[1], [0], [0], [1], [0, 0, 1, 1], [], []>} : vector<16x128xbf16>, vector<128x256xbf16>, vector<16x256xf32> -> vector<16x256xf32>
    %23 = vector.extract_strided_slice %22 {offsets = [0, 0], sizes = [16, 128], strides = [1, 1]} : vector<16x256xf32> to vector<16x128xf32>
    %c0_11 = arith.constant 0 : index
    %c0_12 = arith.constant 0 : index
    %24 = vector.load %arg2[%c0_11, %c0_12] : memref<16x128xf32, #tpu.memory_space<vmem>>, vector<16x128xf32>
    %c0_13 = arith.constant 0 : index
    %c0_14 = arith.constant 0 : index
    %25 = vector.load %arg3[%c0_13, %c0_14] : memref<16x128xf32, #tpu.memory_space<vmem>>, vector<16x128xf32>
    %26 = tpu.iota {dimensions = array<i32: 1>} : vector<16x128xi32>
    %c32_i32 = arith.constant 32 : i32
    %c0_i32_15 = arith.constant 0 : i32
    %27 = arith.cmpi eq, %c32_i32, %c0_i32_15 : i32
    %c1_i32 = arith.constant 1 : i32
    %28 = arith.select %27, %c1_i32, %c32_i32 : i32
    %29 = vector.broadcast %28 : i32 to vector<16x128xi32>
    %30 = arith.remsi %26, %29 : vector<16x128xi32>
    %c0_i32_16 = arith.constant 0 : i32
    %31 = vector.broadcast %c0_i32_16 : i32 to vector<16x128xi32>
    %32 = arith.cmpi ne, %30, %31 : vector<16x128xi32>
    %c0_i32_17 = arith.constant 0 : i32
    %33 = vector.broadcast %c0_i32_17 : i32 to vector<16x128xi32>
    %34 = arith.cmpi slt, %30, %33 : vector<16x128xi32>
    %c0_i32_18 = arith.constant 0 : i32
    %35 = arith.cmpi slt, %28, %c0_i32_18 : i32
    %36 = vector.broadcast %35 : i1 to vector<16x128xi1>
    %37 = vector.broadcast %36 : vector<16x128xi1> to vector<16x128xi1>
    %38 = arith.xori %34, %37 : vector<16x128xi1>
    %39 = arith.andi %38, %32 : vector<16x128xi1>
    %40 = vector.broadcast %28 : i32 to vector<16x128xi32>
    %41 = arith.addi %30, %40 : vector<16x128xi32>
    %42 = arith.select %39, %41, %30 : vector<16x128xi1>, vector<16x128xi32>
    %c16_i32 = arith.constant 16 : i32
    %43 = vector.broadcast %c16_i32 : i32 to vector<16x128xi32>
    %44 = arith.cmpi slt, %42, %43 : vector<16x128xi32>
    %c112_i32 = arith.constant 112 : i32
    %45 = tpu.dynamic_rotate %23 by %c112_i32 dim 1 : vector<16x128xf32>, i32 -> vector<16x128xf32>
    %c16_i32_19 = arith.constant 16 : i32
    %46 = tpu.dynamic_rotate %23 by %c16_i32_19 dim 1 : vector<16x128xf32>, i32 -> vector<16x128xf32>
    %47 = arith.select %44, %45, %46 : vector<16x128xi1>, vector<16x128xf32>
    %48 = arith.mulf %23, %24 : vector<16x128xf32>
    %49 = arith.mulf %47, %25 : vector<16x128xf32>
    %50 = arith.addf %48, %49 : vector<16x128xf32>
    %51 = vector.extract_strided_slice %22 {offsets = [0, 128], sizes = [16, 128], strides = [1, 1]} : vector<16x256xf32> to vector<16x128xf32>
    %c0_20 = arith.constant 0 : index
    %c0_21 = arith.constant 0 : index
    %52 = vector.load %arg4[%c0_20, %c0_21] : memref<16x128xf32, #tpu.memory_space<vmem>>, vector<16x128xf32>
    %c0_22 = arith.constant 0 : index
    %c0_23 = arith.constant 0 : index
    %53 = vector.load %arg5[%c0_22, %c0_23] : memref<16x128xf32, #tpu.memory_space<vmem>>, vector<16x128xf32>
    %54 = tpu.iota {dimensions = array<i32: 1>} : vector<16x128xi32>
    %c32_i32_24 = arith.constant 32 : i32
    %c0_i32_25 = arith.constant 0 : i32
    %55 = arith.cmpi eq, %c32_i32_24, %c0_i32_25 : i32
    %c1_i32_26 = arith.constant 1 : i32
    %56 = arith.select %55, %c1_i32_26, %c32_i32_24 : i32
    %57 = vector.broadcast %56 : i32 to vector<16x128xi32>
    %58 = arith.remsi %54, %57 : vector<16x128xi32>
    %c0_i32_27 = arith.constant 0 : i32
    %59 = vector.broadcast %c0_i32_27 : i32 to vector<16x128xi32>
    %60 = arith.cmpi ne, %58, %59 : vector<16x128xi32>
    %c0_i32_28 = arith.constant 0 : i32
    %61 = vector.broadcast %c0_i32_28 : i32 to vector<16x128xi32>
    %62 = arith.cmpi slt, %58, %61 : vector<16x128xi32>
    %c0_i32_29 = arith.constant 0 : i32
    %63 = arith.cmpi slt, %56, %c0_i32_29 : i32
    %64 = vector.broadcast %63 : i1 to vector<16x128xi1>
    %65 = vector.broadcast %64 : vector<16x128xi1> to vector<16x128xi1>
    %66 = arith.xori %62, %65 : vector<16x128xi1>
    %67 = arith.andi %66, %60 : vector<16x128xi1>
    %68 = vector.broadcast %56 : i32 to vector<16x128xi32>
    %69 = arith.addi %58, %68 : vector<16x128xi32>
    %70 = arith.select %67, %69, %58 : vector<16x128xi1>, vector<16x128xi32>
    %c16_i32_30 = arith.constant 16 : i32
    %71 = vector.broadcast %c16_i32_30 : i32 to vector<16x128xi32>
    %72 = arith.cmpi slt, %70, %71 : vector<16x128xi32>
    %c112_i32_31 = arith.constant 112 : i32
    %73 = tpu.dynamic_rotate %51 by %c112_i32_31 dim 1 : vector<16x128xf32>, i32 -> vector<16x128xf32>
    %c16_i32_32 = arith.constant 16 : i32
    %74 = tpu.dynamic_rotate %51 by %c16_i32_32 dim 1 : vector<16x128xf32>, i32 -> vector<16x128xf32>
    %75 = arith.select %72, %73, %74 : vector<16x128xi1>, vector<16x128xf32>
    %76 = arith.mulf %51, %52 : vector<16x128xf32>
    %77 = arith.mulf %75, %53 : vector<16x128xf32>
    %78 = arith.addf %76, %77 : vector<16x128xf32>
    %79 = vector.extract_strided_slice %50 {offsets = [0, 0], sizes = [16, 32], strides = [1, 1]} : vector<16x128xf32> to vector<16x32xf32>
    %80 = vector.extract_strided_slice %50 {offsets = [0, 32], sizes = [16, 32], strides = [1, 1]} : vector<16x128xf32> to vector<16x32xf32>
    %81 = vector.extract_strided_slice %50 {offsets = [0, 64], sizes = [16, 32], strides = [1, 1]} : vector<16x128xf32> to vector<16x32xf32>
    %82 = vector.extract_strided_slice %50 {offsets = [0, 96], sizes = [16, 32], strides = [1, 1]} : vector<16x128xf32> to vector<16x32xf32>
    %83 = vector.shape_cast %79 : vector<16x32xf32> to vector<1x16x32xf32>
    %84 = vector.shape_cast %80 : vector<16x32xf32> to vector<1x16x32xf32>
    %85 = vector.shape_cast %81 : vector<16x32xf32> to vector<1x16x32xf32>
    %86 = vector.shape_cast %82 : vector<16x32xf32> to vector<1x16x32xf32>
    %87 = tpu.concatenate %83, %84, %85, %86 in 0 : vector<1x16x32xf32>, vector<1x16x32xf32>, vector<1x16x32xf32>, vector<1x16x32xf32> -> vector<4x16x32xf32>
    %88 = vector.extract_strided_slice %78 {offsets = [0, 0], sizes = [16, 32], strides = [1, 1]} : vector<16x128xf32> to vector<16x32xf32>
    %89 = vector.extract_strided_slice %78 {offsets = [0, 32], sizes = [16, 32], strides = [1, 1]} : vector<16x128xf32> to vector<16x32xf32>
    %90 = vector.shape_cast %88 : vector<16x32xf32> to vector<1x16x32xf32>
    %91 = vector.shape_cast %89 : vector<16x32xf32> to vector<1x16x32xf32>
    %92 = tpu.concatenate %90, %91 in 0 : vector<1x16x32xf32>, vector<1x16x32xf32> -> vector<2x16x32xf32>
    %93 = vector.extract_strided_slice %78 {offsets = [0, 64], sizes = [16, 32], strides = [1, 1]} : vector<16x128xf32> to vector<16x32xf32>
    %94 = vector.extract_strided_slice %78 {offsets = [0, 96], sizes = [16, 32], strides = [1, 1]} : vector<16x128xf32> to vector<16x32xf32>
    %95 = vector.shape_cast %93 : vector<16x32xf32> to vector<1x16x32xf32>
    %96 = vector.shape_cast %94 : vector<16x32xf32> to vector<1x16x32xf32>
    %97 = tpu.concatenate %95, %96 in 0 : vector<1x16x32xf32>, vector<1x16x32xf32> -> vector<2x16x32xf32>
    %98 = vector.shape_cast %92 : vector<2x16x32xf32> to vector<2x1x16x32xf32>
    %99 = vector.shape_cast %98 : vector<2x1x16x32xf32> to vector<2x1x16x32xf32>
    %100 = vector.broadcast %99 : vector<2x1x16x32xf32> to vector<2x2x16x32xf32>
    %101 = vector.shape_cast %100 : vector<2x2x16x32xf32> to vector<4x16x32xf32>
    %102 = vector.shape_cast %97 : vector<2x16x32xf32> to vector<2x1x16x32xf32>
    %103 = vector.shape_cast %102 : vector<2x1x16x32xf32> to vector<2x1x16x32xf32>
    %104 = vector.broadcast %103 : vector<2x1x16x32xf32> to vector<2x2x16x32xf32>
    %105 = vector.shape_cast %104 : vector<2x2x16x32xf32> to vector<4x16x32xf32>
    %106 = arith.truncf %87 : vector<4x16x32xf32> to vector<4x16x32xbf16>
    %107 = arith.truncf %101 : vector<4x16x32xf32> to vector<4x16x32xbf16>
    "tpu.trace_start"() <{level = 10 : i32, message = "htd,hsd->hts"}> : () -> ()
    %cst_33 = arith.constant dense<0.000000e+00> : vector<4x16x16xf32>
    %108 = tpu.matmul %106, %107, %cst_33 {dimension_numbers = #tpu.dot_dimension_numbers<[2], [2], [1], [1], [0, 0, 0, 1, 1, 1], [0], [0]>} : vector<4x16x32xbf16>, vector<4x16x32xbf16>, vector<4x16x16xf32> -> vector<4x16x16xf32>
    "tpu.trace_stop"() : () -> ()
    %cst_34 = arith.constant 0.176776692 : f32
    %109 = vector.broadcast %cst_34 : f32 to vector<4x16x16xf32>
    %110 = arith.mulf %108, %109 : vector<4x16x16xf32>
    %111 = tpu.iota {dimensions = array<i32: 0>} : vector<16x16xi32>
    %112 = tpu.iota {dimensions = array<i32: 1>} : vector<16x16xi32>
    %113 = arith.cmpi sle, %112, %111 : vector<16x16xi32>
    %114 = vector.shape_cast %113 : vector<16x16xi1> to vector<1x16x16xi1>
    %cst_35 = arith.constant -1.000000e+30 : f32
    %115 = vector.shape_cast %114 : vector<1x16x16xi1> to vector<1x16x16xi1>
    %116 = vector.broadcast %115 : vector<1x16x16xi1> to vector<4x16x16xi1>
    %117 = vector.broadcast %cst_35 : f32 to vector<4x16x16xf32>
    %118 = arith.select %116, %110, %117 : vector<4x16x16xi1>, vector<4x16x16xf32>
    %cst_36 = arith.constant dense<0xFF800000> : vector<4x16xf32>
    %119 = vector.multi_reduction <maximumf>, %118, %cst_36 [2] : vector<4x16x16xf32> to vector<4x16xf32>
    %120 = vector.shape_cast %119 : vector<4x16xf32> to vector<4x16x1xf32>
    %121 = vector.broadcast %120 : vector<4x16x1xf32> to vector<4x16x16xf32>
    %122 = arith.subf %118, %121 : vector<4x16x16xf32>
    %123 = math.exp %122 : vector<4x16x16xf32>
    %cst_37 = arith.constant dense<0.000000e+00> : vector<4x16xf32>
    %124 = vector.multi_reduction <add>, %123, %cst_37 [2] : vector<4x16x16xf32> to vector<4x16xf32>
    %125 = vector.shape_cast %124 : vector<4x16xf32> to vector<4x16x1xf32>
    %126 = arith.truncf %123 : vector<4x16x16xf32> to vector<4x16x16xbf16>
    %127 = arith.truncf %105 : vector<4x16x32xf32> to vector<4x16x32xbf16>
    "tpu.trace_start"() <{level = 10 : i32, message = "hts,hsd->htd"}> : () -> ()
    %cst_38 = arith.constant dense<0.000000e+00> : vector<4x16x32xf32>
    %128 = tpu.matmul %126, %127, %cst_38 {dimension_numbers = #tpu.dot_dimension_numbers<[2], [1], [1], [2], [0, 0, 0, 1, 1, 2], [0], [0]>} : vector<4x16x16xbf16>, vector<4x16x32xbf16>, vector<4x16x32xf32> -> vector<4x16x32xf32>
    "tpu.trace_stop"() : () -> ()
    %129 = tpu.reciprocal %125 {approx = true} : vector<4x16x1xf32> -> vector<4x16x1xf32>
    %130 = vector.broadcast %129 : vector<4x16x1xf32> to vector<4x16x32xf32>
    %131 = arith.mulf %128, %130 : vector<4x16x32xf32>
    %132 = arith.truncf %131 : vector<4x16x32xf32> to vector<4x16x32xbf16>
    %c0_39 = arith.constant 0 : index
    %c0_40 = arith.constant 0 : index
    %c0_41 = arith.constant 0 : index
    %c0_42 = arith.constant 0 : index
    %133 = vector.load %arg9[%c0_39, %c0_40, %c0_41, %c0_42] : memref<1x4x32x128xbf16, #tpu.memory_space<vmem>>, vector<1x4x32x128xbf16>
    %134 = vector.shape_cast %133 : vector<1x4x32x128xbf16> to vector<4x32x128xbf16>
    "tpu.trace_start"() <{level = 10 : i32, message = "htd,hde->hte"}> : () -> ()
    %cst_43 = arith.constant dense<0.000000e+00> : vector<4x16x128xf32>
    %135 = tpu.matmul %132, %134, %cst_43 {dimension_numbers = #tpu.dot_dimension_numbers<[2], [1], [1], [2], [0, 0, 0, 1, 1, 2], [0], [0]>} : vector<4x16x32xbf16>, vector<4x32x128xbf16>, vector<4x16x128xf32> -> vector<4x16x128xf32>
    "tpu.trace_stop"() : () -> ()
    %cst_44 = arith.constant dense<0.000000e+00> : vector<16x128xf32>
    %136 = vector.multi_reduction <add>, %135, %cst_44 [0] : vector<4x16x128xf32> to vector<16x128xf32>
    %137 = arith.addf %136, %3 : vector<16x128xf32>
    %c0_45 = arith.constant 0 : index
    %c0_46 = arith.constant 0 : index
    %c0_47 = arith.constant 0 : index
    %138 = vector.load %arg10[%c0_45, %c0_46, %c0_47] : memref<1x1x128xbf16, #tpu.memory_space<vmem>>, vector<1x1x128xbf16>
    %139 = vector.shape_cast %138 : vector<1x1x128xbf16> to vector<1x128xbf16>
    %140 = arith.extf %139 : vector<1x128xbf16> to vector<1x128xf32>
    %141 = arith.mulf %137, %137 : vector<16x128xf32>
    %cst_48 = arith.constant dense<0.000000e+00> : vector<16xf32>
    %142 = vector.multi_reduction <add>, %141, %cst_48 [1] : vector<16x128xf32> to vector<16xf32>
    %143 = vector.shape_cast %142 : vector<16xf32> to vector<16x1xf32>
    %cst_49 = arith.constant 1.280000e+02 : f32
    %144 = vector.broadcast %cst_49 : f32 to vector<16x1xf32>
    %145 = arith.divf %143, %144 : vector<16x1xf32>
    %cst_50 = arith.constant 9.99999997E-7 : f32
    %146 = vector.broadcast %cst_50 : f32 to vector<16x1xf32>
    %147 = arith.addf %145, %146 : vector<16x1xf32>
    %148 = math.rsqrt %147 : vector<16x1xf32>
    %149 = vector.broadcast %148 : vector<16x1xf32> to vector<16x128xf32>
    %150 = arith.mulf %137, %149 : vector<16x128xf32>
    %151 = vector.broadcast %140 : vector<1x128xf32> to vector<16x128xf32>
    %152 = arith.mulf %150, %151 : vector<16x128xf32>
    %153 = arith.truncf %152 : vector<16x128xf32> to vector<16x128xbf16>
    %c0_51 = arith.constant 0 : index
    %c0_52 = arith.constant 0 : index
    %c0_53 = arith.constant 0 : index
    %154 = vector.load %arg11[%c0_51, %c0_52, %c0_53] : memref<1x128x512xbf16, #tpu.memory_space<vmem>>, vector<1x128x512xbf16>
    %155 = vector.shape_cast %154 : vector<1x128x512xbf16> to vector<128x512xbf16>
    %cst_54 = arith.constant dense<0.000000e+00> : vector<16x512xf32>
    %156 = tpu.matmul %153, %155, %cst_54 {dimension_numbers = #tpu.dot_dimension_numbers<[1], [0], [0], [1], [0, 0, 1, 1], [], []>} : vector<16x128xbf16>, vector<128x512xbf16>, vector<16x512xf32> -> vector<16x512xf32>
    %157 = vector.extract_strided_slice %156 {offsets = [0, 0], sizes = [16, 256], strides = [1, 1]} : vector<16x512xf32> to vector<16x256xf32>
    %cst_55 = arith.constant 0.000000e+00 : f32
    %158 = vector.broadcast %cst_55 : f32 to vector<16x256xf32>
    %159 = arith.subf %158, %157 : vector<16x256xf32>
    %160 = math.exp %159 : vector<16x256xf32>
    %cst_56 = arith.constant 1.000000e+00 : f32
    %161 = vector.broadcast %cst_56 : f32 to vector<16x256xf32>
    %162 = arith.addf %161, %160 : vector<16x256xf32>
    %cst_57 = arith.constant 1.000000e+00 : f32
    %163 = vector.broadcast %cst_57 : f32 to vector<16x256xf32>
    %164 = arith.divf %163, %162 : vector<16x256xf32>
    %165 = arith.mulf %157, %164 : vector<16x256xf32>
    %166 = vector.extract_strided_slice %156 {offsets = [0, 256], sizes = [16, 256], strides = [1, 1]} : vector<16x512xf32> to vector<16x256xf32>
    %167 = arith.mulf %165, %166 : vector<16x256xf32>
    %168 = arith.truncf %167 : vector<16x256xf32> to vector<16x256xbf16>
    %c0_58 = arith.constant 0 : index
    %c0_59 = arith.constant 0 : index
    %c0_60 = arith.constant 0 : index
    %169 = vector.load %arg12[%c0_58, %c0_59, %c0_60] : memref<1x256x128xbf16, #tpu.memory_space<vmem>>, vector<1x256x128xbf16>
    %170 = vector.shape_cast %169 : vector<1x256x128xbf16> to vector<256x128xbf16>
    %cst_61 = arith.constant dense<0.000000e+00> : vector<16x128xf32>
    %171 = tpu.matmul %168, %170, %cst_61 {dimension_numbers = #tpu.dot_dimension_numbers<[1], [0], [0], [1], [0, 0, 1, 1], [], []>} : vector<16x256xbf16>, vector<256x128xbf16>, vector<16x128xf32> -> vector<16x128xf32>
    %172 = arith.addf %171, %137 : vector<16x128xf32>
    %c0_62 = arith.constant 0 : index
    %c0_63 = arith.constant 0 : index
    %173 = vector.load %arg14[%c0_62, %c0_63] : memref<16x128xf32, #tpu.memory_space<vmem>>, vector<16x128xf32>
    tpu.vector_store %arg14[%c0_62, %c0_63], %172 {strides = array<i32>} : memref<16x128xf32, #tpu.memory_space<vmem>>, vector<16x128xf32>,
    %c1_i32_64 = arith.constant 1 : i32
    %174 = arith.cmpi eq, %arg0, %c1_i32_64 : i32
    %175 = arith.extui %174 : i1 to i32
    %c0_i32_65 = arith.constant 0 : i32
    %176 = arith.cmpi ne, %175, %c0_i32_65 : i32
    scf.if %176 {
      %c0_66 = arith.constant 0 : index
      %c0_67 = arith.constant 0 : index
      %177 = vector.load %arg6[%c0_66, %c0_67] : memref<1x128xbf16, #tpu.memory_space<vmem>>, vector<1x128xbf16>
      %178 = arith.extf %177 : vector<1x128xbf16> to vector<1x128xf32>
      %179 = arith.mulf %172, %172 : vector<16x128xf32>
      %cst_68 = arith.constant dense<0.000000e+00> : vector<16xf32>
      %180 = vector.multi_reduction <add>, %179, %cst_68 [1] : vector<16x128xf32> to vector<16xf32>
      %181 = vector.shape_cast %180 : vector<16xf32> to vector<16x1xf32>
      %cst_69 = arith.constant 1.280000e+02 : f32
      %182 = vector.broadcast %cst_69 : f32 to vector<16x1xf32>
      %183 = arith.divf %181, %182 : vector<16x1xf32>
      %cst_70 = arith.constant 9.99999997E-7 : f32
      %184 = vector.broadcast %cst_70 : f32 to vector<16x1xf32>
      %185 = arith.addf %183, %184 : vector<16x1xf32>
      %186 = math.rsqrt %185 : vector<16x1xf32>
      %187 = vector.broadcast %186 : vector<16x1xf32> to vector<16x128xf32>
      %188 = arith.mulf %172, %187 : vector<16x128xf32>
      %189 = vector.broadcast %178 : vector<1x128xf32> to vector<16x128xf32>
      %190 = arith.mulf %188, %189 : vector<16x128xf32>
      %191 = arith.truncf %190 : vector<16x128xf32> to vector<16x128xbf16>
      %c0_71 = arith.constant 0 : index
      %c0_72 = arith.constant 0 : index
      %192 = vector.load %arg13[%c0_71, %c0_72] : memref<16x128xbf16, #tpu.memory_space<vmem>>, vector<16x128xbf16>
      tpu.vector_store %arg13[%c0_71, %c0_72], %191 {strides = array<i32>} : memref<16x128xbf16, #tpu.memory_space<vmem>>, vector<16x128xbf16>,
    } else {
    }
    return
  }
  func.func @transform_0(%arg0: i32) -> (i32, i32) {
    %c0_i32 = arith.constant 0 : i32
    %c0_i32_0 = arith.constant 0 : i32
    %c0_i32_1 = arith.constant 0 : i32
    return %c0_i32, %c0_i32_0 : i32, i32
  }
  func.func @transform_1(%arg0: i32) -> (i32, i32) {
    %c0_i32 = arith.constant 0 : i32
    %c0_i32_0 = arith.constant 0 : i32
    %c0_i32_1 = arith.constant 0 : i32
    return %c0_i32, %c0_i32_0 : i32, i32
  }
  func.func @transform_2(%arg0: i32) -> (i32, i32) {
    %c0_i32 = arith.constant 0 : i32
    %c0_i32_0 = arith.constant 0 : i32
    %c0_i32_1 = arith.constant 0 : i32
    return %c0_i32, %c0_i32_0 : i32, i32
  }
  func.func @transform_3(%arg0: i32) -> (i32, i32) {
    %c0_i32 = arith.constant 0 : i32
    %c0_i32_0 = arith.constant 0 : i32
    %c0_i32_1 = arith.constant 0 : i32
    return %c0_i32, %c0_i32_0 : i32, i32
  }
  func.func @transform_4(%arg0: i32) -> (i32, i32) {
    %c0_i32 = arith.constant 0 : i32
    %c0_i32_0 = arith.constant 0 : i32
    %c0_i32_1 = arith.constant 0 : i32
    return %c0_i32, %c0_i32_0 : i32, i32
  }
  func.func @transform_5(%arg0: i32) -> (i32, i32) {
    %c0_i32 = arith.constant 0 : i32
    %c0_i32_0 = arith.constant 0 : i32
    %c0_i32_1 = arith.constant 0 : i32
    return %c0_i32, %c0_i32_0 : i32, i32
  }
  func.func @transform_6(%arg0: i32) -> (i32, i32, i32) {
    %c0_i32 = arith.constant 0 : i32
    %c0_i32_0 = arith.constant 0 : i32
    %c0_i32_1 = arith.constant 0 : i32
    return %arg0, %c0_i32, %c0_i32_0 : i32, i32, i32
  }
  func.func @transform_7(%arg0: i32) -> (i32, i32, i32) {
    %c0_i32 = arith.constant 0 : i32
    %c0_i32_0 = arith.constant 0 : i32
    %c0_i32_1 = arith.constant 0 : i32
    return %arg0, %c0_i32, %c0_i32_0 : i32, i32, i32
  }
  func.func @transform_8(%arg0: i32) -> (i32, i32, i32, i32) {
    %c0_i32 = arith.constant 0 : i32
    %c0_i32_0 = arith.constant 0 : i32
    %c0_i32_1 = arith.constant 0 : i32
    %c0_i32_2 = arith.constant 0 : i32
    return %arg0, %c0_i32, %c0_i32_0, %c0_i32_1 : i32, i32, i32, i32
  }
  func.func @transform_9(%arg0: i32) -> (i32, i32, i32) {
    %c0_i32 = arith.constant 0 : i32
    %c0_i32_0 = arith.constant 0 : i32
    %c0_i32_1 = arith.constant 0 : i32
    return %arg0, %c0_i32, %c0_i32_0 : i32, i32, i32
  }
  func.func @transform_10(%arg0: i32) -> (i32, i32, i32) {
    %c0_i32 = arith.constant 0 : i32
    %c0_i32_0 = arith.constant 0 : i32
    %c0_i32_1 = arith.constant 0 : i32
    return %arg0, %c0_i32, %c0_i32_0 : i32, i32, i32
  }
  func.func @transform_11(%arg0: i32) -> (i32, i32, i32) {
    %c0_i32 = arith.constant 0 : i32
    %c0_i32_0 = arith.constant 0 : i32
    %c0_i32_1 = arith.constant 0 : i32
    return %arg0, %c0_i32, %c0_i32_0 : i32, i32, i32
  }
  func.func @transform_12(%arg0: i32) -> (i32, i32) {
    %c0_i32 = arith.constant 0 : i32
    %c0_i32_0 = arith.constant 0 : i32
    %c0_i32_1 = arith.constant 0 : i32
    return %c0_i32, %c0_i32_0 : i32, i32
  }
}

</mosaic_0001>

<bundles_post_ra>
// kernel: tile.29
= control target key start
LH: loop header
LB: loop body
LE: loop exit
PB: predicated region body
PF: predicated region fallthrough
CT: control target
= control target key end

     0   :  { %vm68_vm0 = vcmask 1047556   ;;  %s167_s9 = smov 64   ;;  %s168_s10 = smov 32   ;;  %vm70_vm1 = vcmask 261120   ;;  %vm89_vm2 = vcmask 1048320   ;;  %vm110_vm3 = vcmask 785920   ;;  %s259_s0 = inlined_call_operand.vmem [shape: f32[16,4,32], index: 0, kind: input, shape index: {}]   ;;  %s260_s1 = inlined_call_operand.vmem [shape: f32[16,128], index: 1, kind: output, shape index: {}]  }
   0x1   :  { %v152_v0 = vld [vmem:[%s259_s0 + $0x1c] sm:$0xf]  ;;  %v153_v1 = vld [vmem:[%s259_s0 + $0x18] sm:$0xf]  ;;  %v154_v2 = vld [vmem:[%s259_s0 + $0x14] sm:$0xf] }
   0x2   :  { %39 = vst [vmem:[#allocation0 + $0x38] sm:$0xf] %v152_v0  ;;  %v155_v3 = vld [vmem:[%s259_s0 + $0x10] sm:$0xf]  ;;  %v156_v4 = vld [vmem:[%s259_s0 + $0xc] sm:$0xf] }
   0x3   :  { %43 = vst [vmem:[#allocation0 + $0x30] sm:$0xf] %v153_v1  ;;  %v157_v5 = vld [vmem:[%s259_s0 + $0x8] sm:$0xf]  ;;  %v158_v6 = vld [vmem:[%s259_s0 + $0x4] sm:$0xf] }
   0x4   :  { %47 = vst [vmem:[#allocation0 + $0x28] sm:$0xf] %v154_v2  ;;  %v64_v7 = vld [vmem:[%s259_s0] sm:$0xf]  ;;  %v144_v8 = vld [vmem:[%s259_s0 + $0x3c] sm:$0xf] }
   0x5   :  { %51 = vst [vmem:[#allocation0 + $0x20] sm:$0xf] %v155_v3  ;;  %v145_v9 = vld [vmem:[%s259_s0 + $0x38] sm:$0xf]  ;;  %v146_v10 = vld [vmem:[%s259_s0 + $0x34] sm:$0xf] }
   0x6   :  { %55 = vst [vmem:[#allocation0 + $0x18] sm:$0xf] %v156_v4  ;;  %v147_v11 = vld [vmem:[%s259_s0 + $0x30] sm:$0xf]  ;;  %v148_v12 = vld [vmem:[%s259_s0 + $0x2c] sm:$0xf] }
   0x7   :  { %59 = vst [vmem:[#allocation0 + $0x10] sm:$0xf] %v157_v5  ;;  %v149_v13 = vld [vmem:[%s259_s0 + $0x28] sm:$0xf]  ;;  %v150_v15 = vld [vmem:[%s259_s0 + $0x24] sm:$0xf] }
   0x8   :  { %63 = vst [vmem:[#allocation0 + $0x8] sm:$0xf] %v158_v6  ;;  %v151_v17 = vld [vmem:[%s259_s0 + $0x20] sm:$0xf]  ;;  %s166_s0 = smov 96   ;;  %vm131_vm4 = vcmask 523520  }
   0x9   :  { %65 = vst [vmem:[#allocation0] sm:$0xf] %v64_v7 }
   0xa   :  { %7 = vst [vmem:[#allocation0 + $0x78] sm:$0xf] %v144_v8 }
   0xb   :  { %11 = vst [vmem:[#allocation0 + $0x70] sm:$0xf] %v145_v9 }
   0xc   :  { %v84_v14 = vld [vmem:[#allocation0 + $0x3] ss:$8 sm:$0xf0]   ;;  %15 = vst [vmem:[#allocation0 + $0x68] sm:$0xf] %v146_v10 }
   0xd   :  { %v105_v16 = vld [vmem:[#allocation0 + $0x2] ss:$8 sm:$0xf0]   ;;  %19 = vst [vmem:[#allocation0 + $0x60] sm:$0xf] %v147_v11 }
   0xe   :  { %23 = vst [vmem:[#allocation0 + $0x58] sm:$0xf] %v148_v12  ;;  %v126_v18 = vld [vmem:[#allocation0 + $0x1] ss:$8 sm:$0xf0]  }
   0xf   :  { %27 = vst [vmem:[#allocation0 + $0x50] sm:$0xf] %v149_v13  ;;  %v67_v35 = vld [vmem:[#allocation0] ss:$8 sm:$0xf0]  }
  0x10   :  { %v82_v19 = vld [vmem:[#allocation0 + $0x3] ss:$8 sm:$0xf]   ;;  %v103_v20 = vld [vmem:[#allocation0 + $0x2] ss:$8 sm:$0xf]  }
  0x11   :  { %v86_v21 = vsel %vm68_vm0, %v84_v14, %v82_v19  ;;  %v107_v22 = vsel %vm68_vm0, %v105_v16, %v103_v20  ;;  %v124_v23 = vld [vmem:[#allocation0 + $0x1] ss:$8 sm:$0xf]   ;;  %31 = vst [vmem:[#allocation0 + $0x48] sm:$0xf] %v150_v15 }
  0x12   :  { %87 = vrot.lane.b32.xlu0 %v86_v21, %s166_s0  ;;  %108 = vrot.lane.b32.xlu1 %v107_v22, %s167_s9  ;;  %v128_v24 = vsel %vm68_vm0, %v126_v18, %v124_v23  ;;  %35 = vst [vmem:[#allocation0 + $0x40] sm:$0xf] %v151_v17  ;;  %v66_v34 = vld [vmem:[#allocation0] ss:$8 sm:$0xf]  }
  0x13   :  { %129 = vrot.lane.b32.xlu2 %v128_v24, %s168_s10  ;;  %v69_v36 = vsel %vm68_vm0, %v67_v35, %v66_v34 }
  0x14   :  { %v94_v25 = vld [vmem:[#allocation0 + $0x43] ss:$8 sm:$0xf0]   ;;  %v115_v26 = vld [vmem:[#allocation0 + $0x42] ss:$8 sm:$0xf0]  }
  0x15   :  { %v136_v27 = vld [vmem:[#allocation0 + $0x41] ss:$8 sm:$0xf0]   ;;  %71 = vst.msk [vmem:[%s260_s1] sm:$0xff] %vm70_vm1, %v69_v36  }
  0x16   :  { %v75_v38 = vld [vmem:[#allocation0 + $0x40] ss:$8 sm:$0xf0]  }
  0x19   :  { %v92_v28 = vld [vmem:[#allocation0 + $0x43] ss:$8 sm:$0xf]   ;;  %v113_v29 = vld [vmem:[#allocation0 + $0x42] ss:$8 sm:$0xf]  }
  0x1a   :  { %v96_v30 = vsel %vm68_vm0, %v94_v25, %v92_v28  ;;  %v117_v31 = vsel %vm68_vm0, %v115_v26, %v113_v29  ;;  %v134_v32 = vld [vmem:[#allocation0 + $0x41] ss:$8 sm:$0xf]   ;;  %v73_v37 = vld [vmem:[#allocation0 + $0x40] ss:$8 sm:$0xf]  }
  0x1b   :  { %97 = vrot.lane.b32.xlu0 %v96_v30, %s166_s0  ;;  %118 = vrot.lane.b32.xlu1 %v117_v31, %s167_s9  ;;  %v138_v33 = vsel %vm68_vm0, %v136_v27, %v134_v32  ;;  %v77_v40 = vsel %vm68_vm0, %v75_v38, %v73_v37 }
  0x1c   :  { %139 = vrot.lane.b32.xlu2 %v138_v33, %s168_s10  ;;  %159 = vst.msk [vmem:[%s260_s1 + $0x8] sm:$0xff] %vm70_vm1, %v77_v40  }
  0x6d   :  { %v130_v39 = vpop.permute.xlu2 %129  }
  0x76   :  { %v140_v41 = vpop.permute.xlu2 %139  }
  0x84   :  { %v88_v42 = vpop.permute.xlu0 %87   ;;  %v109_v43 = vpop.permute.xlu1 %108  }
  0x85   :  { %90 = vst.msk [vmem:[%s260_s1] sm:$0xff] %vm89_vm2, %v88_v42  }
  0x86   :  { %111 = vst.msk [vmem:[%s260_s1] sm:$0xff] %vm110_vm3, %v109_v43  }
  0x87   :  { %132 = vst.msk [vmem:[%s260_s1] sm:$0xff] %vm131_vm4, %v130_v39  }
  0x8d   :  { %v98_v44 = vpop.permute.xlu0 %97   ;;  %v119_v45 = vpop.permute.xlu1 %118  }
  0x8e   :  { %160 = vst.msk [vmem:[%s260_s1 + $0x8] sm:$0xff] %vm89_vm2, %v98_v44  }
  0x8f   :  { %161 = vst.msk [vmem:[%s260_s1 + $0x8] sm:$0xff] %vm110_vm3, %v119_v45  }
  0x90   :  { %162 = vst.msk [vmem:[%s260_s1 + $0x8] sm:$0xff] %vm131_vm4, %v140_v41  }

// kernel: tile.39
= control target key start
LH: loop header
LB: loop body
LE: loop exit
PB: predicated region body
PF: predicated region fallthrough
CT: control target
= control target key end

     0   :  { %vm68_vm0 = vcmask 1047556   ;;  %vm70_vm1 = vcmask 261120   ;;  %vm89_vm2 = vcmask 523520   ;;  %s195_s0 = inlined_call_operand.vmem [shape: f32[16,2,32], index: 0, kind: input, shape index: {}]   ;;  %s196_s1 = inlined_call_operand.vmem [shape: f32[16,64], index: 1, kind: output, shape index: {}]  }
   0x1   :  { %v110_v0 = vld [vmem:[%s195_s0 + $0xe] sm:$0x3]  ;;  %v111_v1 = vld [vmem:[%s195_s0 + $0xc] sm:$0x3]  ;;  %v112_v2 = vld [vmem:[%s195_s0 + $0xa] sm:$0x3] }
   0x2   :  { %39 = vst [vmem:[#allocation0 + $0x38] sm:$0x3] %v110_v0  ;;  %v113_v3 = vld [vmem:[%s195_s0 + $0x8] sm:$0x3]  ;;  %v114_v4 = vld [vmem:[%s195_s0 + $0x6] sm:$0x3] }
   0x3   :  { %43 = vst [vmem:[#allocation0 + $0x30] sm:$0x3] %v111_v1  ;;  %v115_v5 = vld [vmem:[%s195_s0 + $0x4] sm:$0x3]  ;;  %v116_v6 = vld [vmem:[%s195_s0 + $0x2] sm:$0x3] }
   0x4   :  { %47 = vst [vmem:[#allocation0 + $0x28] sm:$0x3] %v112_v2  ;;  %v64_v7 = vld [vmem:[%s195_s0] sm:$0x3]  ;;  %v102_v8 = vld [vmem:[%s195_s0 + $0x1e] sm:$0x3] }
   0x5   :  { %51 = vst [vmem:[#allocation0 + $0x20] sm:$0x3] %v113_v3  ;;  %v103_v9 = vld [vmem:[%s195_s0 + $0x1c] sm:$0x3]  ;;  %v104_v10 = vld [vmem:[%s195_s0 + $0x1a] sm:$0x3] }
   0x6   :  { %55 = vst [vmem:[#allocation0 + $0x18] sm:$0x3] %v114_v4  ;;  %v105_v11 = vld [vmem:[%s195_s0 + $0x18] sm:$0x3]  ;;  %v106_v12 = vld [vmem:[%s195_s0 + $0x16] sm:$0x3] }
   0x7   :  { %59 = vst [vmem:[#allocation0 + $0x10] sm:$0x3] %v115_v5  ;;  %v107_v13 = vld [vmem:[%s195_s0 + $0x14] sm:$0x3]  ;;  %v108_v14 = vld [vmem:[%s195_s0 + $0x12] sm:$0x3] }
   0x8   :  { %63 = vst [vmem:[#allocation0 + $0x8] sm:$0x3] %v116_v6  ;;  %v109_v15 = vld [vmem:[%s195_s0 + $0x10] sm:$0x3]  ;;  %s120_s0 = smov 32  }
   0x9   :  { %65 = vst [vmem:[#allocation0] sm:$0x3] %v64_v7 }
   0xa   :  { %7 = vst [vmem:[#allocation0 + $0x78] sm:$0x3] %v102_v8 }
   0xb   :  { %11 = vst [vmem:[#allocation0 + $0x70] sm:$0x3] %v103_v9 }
   0xc   :  { %15 = vst [vmem:[#allocation0 + $0x68] sm:$0x3] %v104_v10  ;;  %v84_v16 = vld [vmem:[#allocation0 + $0x1] ss:$8 sm:$0xf0]  }
   0xd   :  { %19 = vst [vmem:[#allocation0 + $0x60] sm:$0x3] %v105_v11  ;;  %v67_v23 = vld [vmem:[#allocation0] ss:$8 sm:$0xf0]  }
   0xe   :  { %23 = vst [vmem:[#allocation0 + $0x58] sm:$0x3] %v106_v12 }
   0xf   :  { %27 = vst [vmem:[#allocation0 + $0x50] sm:$0x3] %v107_v13 }
  0x10   :  { %v82_v17 = vld [vmem:[#allocation0 + $0x1] ss:$8 sm:$0xf]   ;;  %31 = vst [vmem:[#allocation0 + $0x48] sm:$0x3] %v108_v14 }
  0x11   :  { %v86_v18 = vsel %vm68_vm0, %v84_v16, %v82_v17  ;;  %35 = vst [vmem:[#allocation0 + $0x40] sm:$0x3] %v109_v15  ;;  %v66_v22 = vld [vmem:[#allocation0] ss:$8 sm:$0xf]  }
  0x12   :  { %87 = vrot.lane.b32.xlu0 %v86_v18, %s120_s0  ;;  %v69_v24 = vsel %vm68_vm0, %v67_v23, %v66_v22 }
  0x13   :  { %71 = vst.msk [vmem:[%s196_s1] sm:$0xff] %vm70_vm1, %v69_v24  }
  0x14   :  { %v94_v19 = vld [vmem:[#allocation0 + $0x41] ss:$8 sm:$0xf0]   ;;  %v75_v26 = vld [vmem:[#allocation0 + $0x40] ss:$8 sm:$0xf0]  }
  0x18   :  { %v92_v20 = vld [vmem:[#allocation0 + $0x41] ss:$8 sm:$0xf]   ;;  %v73_v25 = vld [vmem:[#allocation0 + $0x40] ss:$8 sm:$0xf]  }
  0x19   :  { %v96_v21 = vsel %vm68_vm0, %v94_v19, %v92_v20  ;;  %v77_v27 = vsel %vm68_vm0, %v75_v26, %v73_v25 }
  0x1a   :  { %97 = vrot.lane.b32.xlu0 %v96_v21, %s120_s0  ;;  %117 = vst.msk [vmem:[%s196_s1 + $0x8] sm:$0xff] %vm70_vm1, %v77_v27  }
  0x84   :  { %v88_v28 = vpop.permute.xlu0 %87  }
  0x85   :  { %90 = vst.msk [vmem:[%s196_s1] sm:$0xff] %vm89_vm2, %v88_v28  }
  0x8c   :  { %v98_v29 = vpop.permute.xlu0 %97  }
  0x8d   :  { %118 = vst.msk [vmem:[%s196_s1 + $0x8] sm:$0xff] %vm89_vm2, %v98_v29  }

// kernel: mistral_model_forward.1
= control target key start
LH: loop header
LB: loop body
LE: loop exit
PB: predicated region body
PF: predicated region fallthrough
CT: control target
= control target key end

     0   :  { %s3226_s0 = inlined_call_operand.vmem [shape: bf16[16,128], index: 0, kind: input, shape index: {}]   ;;  %s3227_s1 = inlined_call_operand.vmem [shape: f32[16,128], index: 1, kind: input, shape index: {}]   ;;  %s3228_s2 = inlined_call_operand.vmem [shape: f32[16,128], index: 2, kind: input, shape index: {}]   ;;  %s3229_s3 = inlined_call_operand.vmem [shape: f32[16,128], index: 3, kind: input, shape index: {}]   ;;  %s3230_s4 = inlined_call_operand.vmem [shape: f32[16,128], index: 4, kind: input, shape index: {}]   ;;  %s3231_s5 = inlined_call_operand.vmem [shape: bf16[1,128], index: 5, kind: input, shape index: {}]   ;;  %s3232_s6 = inlined_call_operand.vmem [shape: bf16[2,1,128], index: 6, kind: input, shape index: {}]   ;;  %s3233_s7 = inlined_call_operand.hbm [shape: bf16[2,128,256], index: 7, kind: input, shape index: {}]   ;;  %s3234_s8 = inlined_call_operand.vmem [shape: bf16[2,4,32,128], index: 8, kind: input, shape index: {}]   ;;  %s3235_s9 = inlined_call_operand.vmem [shape: bf16[2,1,128], index: 9, kind: input, shape index: {}]   ;;  %s3236_s10 = inlined_call_operand.vmem [shape: bf16[2,128,512], index: 10, kind: input, shape index: {}]   ;;  %s3237_s11 = inlined_call_operand.hbm [shape: bf16[2,256,128], index: 11, kind: input, shape index: {}]   ;;  %s3238_s12 = inlined_call_operand.hbm [shape: bf16[16,128], index: 12, kind: output, shape index: {}]  }
   0x1   :  { %3245 = sst [smem:[#allocation15_spill]] %s3229_s3 }
   0x2   :  { %3246 = sst [smem:[#allocation16_spill]] %s3231_s5 }
   0x3   :  { %3247 = sst [smem:[#allocation17_spill]] %s3233_s7 }
   0x4   :  { %3248 = sst [smem:[#allocation18_spill]] %s3238_s12 }
   0x5   :  { %17 = vsyncpa [#allocation4], 0 }
   0x6   :  { %19 = vsyncpa [#allocation4 + $0x1], 0 }
   0x7   :  { %20 = vsyncpa [#allocation7], 0 }
   0x8   :  { %22 = vsyncpa [#allocation7 + $0x1], 0 }
   0x9   :  { %23 = vsyncpa [#allocation5], 0  ;;  %s2759_s21 = smov 0   ;;  %s2761_s22 = smov 0  }
   0xa   :  { %s2763_s23 = smov 0   ;;  %s2765_s24 = smov 0  }
   0xb LB: > { %3249 = sst [smem:[#allocation12_spill]] %s2676_s23  ;;  %s2778_s25 = sadd.s32 4294967295, %s2680_s24   ;;  %s2680_s24 = sphi %s2765_s24, %s3268_s24   ;;  %s2676_s23 = sphi %s2763_s23, %s3270_s23   ;;  %s2672_s22 = sphi %s2761_s22, %s3272_s22   ;;  %s2668_s21 = sphi %s2759_s21, %s3271_s21  }
   0xc   : > { %s2781_s26 = sadd.s32 1, %s2680_s24   ;;  %s188_s28 = sadd.s32 1, %s2676_s23 }
   0xd   : > { %3250 = sst [smem:[#allocation13_spill]] %s2781_s26  ;;  %s185_s27 = ssub.s32 %s2680_s24, %s2781_s26 }
   0xe   : > { %p186_p0 = scmp.eq.s32.totalorder %s185_s27, 0  ;;  %p195_p1 = scmp.ne.s32.totalorder %s2676_s23, %s2672_s22 }
   0xf   : > { %p196_p2 = scmp.eq.s32.totalorder %s2680_s24, 0  ;;  %p201_p3 = scmp.ne.s32.totalorder %s2672_s22, %s2668_s21 }
  0x10   : > { %s2791_s29 = scalar_select %p186_p0, %s2676_s23, %s188_s28  }
  0x11   : > { %p2793_p4 = por %p196_p2, %p195_p1  ;;  %p202_p5 = scmp.eq.s32.totalorder %s2778_s25, 0 }
  0x12   : > { %3251 = sst [smem:[#allocation14_spill]] %s2791_s29  ;;  %p2421_p6 = scmp.lt.s32.totalorder %s2680_s24, 2 }
  0x13   : > { %p2799_p7 = por %p202_p5, %p201_p3  ;;  %s2804_s14 = sand.u32 1, %s2676_s23  }
  0x14   : > { %s3242_s15 = sshll.u32 %s2804_s14, 7  ;;  %s3243_s16 = sshll.u32 %s2680_s24, 7 }
  0x15   : > { %s3254_s7 = sld [smem:[#allocation17_spill]]  ;;  %s378_s20 = scalar_lea.vmem [#allocation3], %s3242_s15 }
  0x16   : > { %s386_s21 = sshll.u32 %s378_s20, 4  ;;  %p2817_p8 = pnand %p2421_p6, %p2793_p4  ;;  %s387_s21 = int_to_ptr.vmem [resolvable:$true] %s386_s21 }
  0x17   : > { %p2008_p9 = scmp.ge.s32.totalorder %s2680_s24, 1  ;;  %s375_s29 = scalar_lea.sflag [#allocation4], %s2804_s14 }
  0x18   : > { %p2554_p11 = pneg %p2817_p8 }
  0x1b   : > { %s383_s19 = scalar_lea.hbm %s3254_s7, %s3243_s16  ;;  %s2557_s18 = scalar_lea.hbm %s3254_s7, 256 }
  0x1c   : > { %s384_s27 = sshll.u32 %s383_s19, 4  ;;  %s385_s27 = int_to_ptr.hbm [resolvable:$true] %s384_s27 }
  0x1d   : > { %s2550_s23 = sshra.s32 %s385_s27, 4  ;;  %s2551_s23 = int_to_ptr.hbm [resolvable:$true] %s2550_s23 }
  0x1e   : > { %s2552_s26 = scalar_lea.hbm %s2551_s23, 128  ;;  %p2558_p0 = scmp.lt.s32.totalorder %s2551_s23, %s3254_s7 }
  0x1f   : > { %p2553_p10 = scmp.ne.s32.totalorder %s2551_s23, %s2552_s26  ;;  %p2559_p1 = scmp.lt.s32.totalorder %s2557_s18, %s2552_s26 }
  0x21   : > { %p2555_p12 = pnand %p2554_p11, %p2553_p10  ;;  %p2560_p2 = por %p2559_p1, %p2558_p0 }
  0x23   : > { %p2556_p13 = pneg %p2555_p12 }
  0x25   : > { %p2561_p3 = pnand %p2560_p2, %p2556_p13 }
  0x27   : > { %2564 = shalt.err (!%p2561_p3)
}
  0x28   : > { %s2682_s15 = smov 128   ;;  %s2683_s16 = smov 8  }
  0x29   : > { %2417 = dma.hbm_to_vmem [thread:$0]  (!%p2817_p8), %s385_s27, 2048, %s387_s21, %s375_s29, %s2682_s15, %s2682_s15, %s2683_s16  }
  0x2a   : > { %p438_p4 = scmp.lt.s32.totalorder %s2680_s24, 3  ;;  %s3256_s17 = sshll.u32 %s2680_s24, 7 }
  0x2b   : > { %s427_s23 = scalar_lea.hbm %s3237_s11, %s3256_s17  ;;  %s3258_s20 = sshll.u32 %s2804_s14, 7 }
  0x2c   : > { %p2844_p5 = pnand %p2008_p9, %p438_p4  ;;  %s428_s18 = sshll.u32 %s427_s23, 4  ;;  %s429_s18 = int_to_ptr.hbm [resolvable:$true] %s428_s18 }
  0x2d   : > { %s422_s7 = scalar_lea.vmem [#allocation6], %s3258_s20  ;;  %s419_s5 = scalar_lea.sflag [#allocation7], %s2804_s14 }
  0x2e   : > { %s430_s12 = sshll.u32 %s422_s7, 4  ;;  %s2580_s3 = sshra.s32 %s429_s18, 4  ;;  %s431_s12 = int_to_ptr.vmem [resolvable:$true] %s430_s12  ;;  %s2581_s3 = int_to_ptr.hbm [resolvable:$true] %s2580_s3 }
  0x2f   : > { %s2582_s29 = scalar_lea.hbm %s2581_s3, 128  ;;  %s2587_s16 = scalar_lea.hbm %s3237_s11, 256 }
  0x30   : > { %p2583_p6 = scmp.ne.s32.totalorder %s2581_s3, %s2582_s29  ;;  %p2588_p9 = scmp.lt.s32.totalorder %s2581_s3, %s3237_s11 }
  0x31   : > { %p2589_p13 = scmp.lt.s32.totalorder %s2587_s16, %s2582_s29 }
  0x32   : > { %p2585_p10 = pnand %p2583_p6, %p2554_p11 }
  0x33   : > { %p2590_p0 = por %p2589_p13, %p2588_p9 }
  0x34   : > { %p2586_p12 = pneg %p2585_p10 }
  0x36   : > { %p2591_p1 = pnand %p2590_p0, %p2586_p12 }
  0x38   : > { %2594 = shalt.err (!%p2591_p1)
}
  0x39   : > { %s2684_s7 = smov 64   ;;  %s2685_s14 = smov 4  }
  0x3a   : > { %2420 = dma.hbm_to_vmem [thread:$0]  (!%p2817_p8), %s429_s18, 2048, %s431_s12, %s419_s5, %s2684_s7, %s2684_s7, %s2685_s14  }
  0x3b   : > { %442 = sbr.rel (%p2844_p5) target bundleno = 1847 (0x737), region = 68  ;;  %s444_s17 = sand.u32 (!%p2844_p5), 1, %s2672_s22  }
  0x3c   : > { %s2009_s30 = sshll.u32 (!%p2844_p5), %s444_s17, 7  ;;  %s445_s19 = scalar_lea.sflag (!%p2844_p5), [#allocation4], %s444_s17 }
  0x3d   : > { %s2865_s23 = scalar_lea.vmem (!%p2844_p5), [#allocation3], %s2009_s30 }
  0x40   : > { %2655 = dma.done.wait (%p2799_p7), %s445_s19, 2048  }
  0x41   : > { %2657 = vsyncadd (%p2799_p7), %s445_s19, 4294965248  ;;  %s455_s3 = scalar_lea.sflag [#allocation7], %s444_s17  ;;  %s2871_s20 = scalar_lea.vmem [#allocation6], %s2009_s30 }
  0x42   : > { %2659 = dma.done.wait (%p2799_p7), %s455_s3, 2048  }
  0x43   : > { %2661 = vsyncadd (%p2799_p7), %s455_s3, 4294965248  ;;  %p516_p8 = scmp.lt.s32.totalorder %s2778_s25, 1  ;;  %p2015_p7 = scmp.ne.s32.totalorder %s2778_s25, 0 }
  0x45   : > { %s2879_s5 = scalar_select %p516_p8, %s2778_s25, 1 }
  0x46   : > { %536 = sbr.rel (%p2015_p7) target bundleno = 80 (0x50), region = 80 }
  0x47   : > { %s518_s26 = scalar_lea.vmem %s3232_s6, %s2879_s5  ;;  %s2323_s18 = sshll.u32 %s2879_s5, 6 }
  0x48   : > { %s2889_s15 = scalar_lea.vmem %s3234_s8, %s2323_s18  ;;  %s526_s21 = scalar_lea.vmem %s3235_s9, %s2879_s5 }
  0x49   : > { %s2324_s27 = sshll.u32 %s2879_s5, 8 }
  0x4a   : > { %s2899_s17 = scalar_lea.vmem %s3236_s10, %s2324_s27 }
  0x4b   : > { %v2398_v0 = vld [vmem:[%s3226_s0] sm:$0xff]  }
  0x4c   : > { %v2399_v1 = vunpack.c.l.bf16 %v2398_v0  ;;  %v2400_v2 = vunpack.c.h.bf16 %v2398_v0 }
  0x4e   : > { %541 = vst [vmem:[#allocation2] sm:$0xff] %v2399_v1 }
  0x4f   : > { %542 = vst [vmem:[#allocation2 + $0x8] sm:$0xff] %v2400_v2 }
  0x50 PF: > { %v2074_v7 = vld [vmem:[%s2865_s23 + $0x70] sm:$0xf]  ;;  %v2340_v8 = vld [vmem:[%s2865_s23 + $0x74] sm:$0xf0]  ;;  %v2339_v9 = vld [vmem:[%s2865_s23 + $0x74] sm:$0xf] }
  0x51   : > { %v2075_v10 = vor.u32 %v2340_v8, %v2074_v7  ;;  %v2076_v11 = vld [vmem:[%s2865_s23 + $0x78] sm:$0xf0]  ;;  %v2686_v12 = vmov 128.0   ;;  %v2066_v14 = vld [vmem:[%s2865_s23 + $0x60] sm:$0xf]  ;;  %s2687_s12 = smov 112  }
  0x52   : > { %2488 = vrcp.f32 %v2686_v12  ;;  %v2079_v13 = vor.u32 %v2339_v9, %v2076_v11  ;;  %v2338_v15 = vld [vmem:[%s2865_s23 + $0x64] sm:$0xf0]  ;;  %v2337_v16 = vld [vmem:[%s2865_s23 + $0x64] sm:$0xf]  ;;  %v2068_v18 = vld [vmem:[%s2865_s23 + $0x68] sm:$0xf0] }
  0x53   : > { %686 = vmatpush.bf16.msra.mxu0 %v2075_v10  ;;  %v2067_v17 = vor.u32 %v2338_v15, %v2066_v14  ;;  %v2071_v19 = vor.u32 %v2337_v16, %v2068_v18  ;;  %v2058_v21 = vld [vmem:[%s2865_s23 + $0x50] sm:$0xf]  ;;  %v2336_v22 = vld [vmem:[%s2865_s23 + $0x54] sm:$0xf0]  ;;  %v2335_v23 = vld [vmem:[%s2865_s23 + $0x54] sm:$0xf] }
  0x54   : > { %700 = vmatpush.bf16.msra.mxu1 %v2079_v13  ;;  %v2059_v24 = vor.u32 %v2336_v22, %v2058_v21  ;;  %v2060_v25 = vld [vmem:[%s2865_s23 + $0x58] sm:$0xf0]  ;;  %v2050_v28 = vld [vmem:[%s2865_s23 + $0x40] sm:$0xf]  ;;  %v2334_v29 = vld [vmem:[%s2865_s23 + $0x44] sm:$0xf0] }
  0x55   : > { %v2905_v3 = vld [vmem:[#allocation2] sm:$0xff]  ;;  %v2063_v26 = vor.u32 %v2335_v23, %v2060_v25  ;;  %v2333_v30 = vld [vmem:[%s2865_s23 + $0x44] sm:$0xf]  ;;  %v2051_v31 = vor.u32 %v2334_v29, %v2050_v28  ;;  %v2052_v32 = vld [vmem:[%s2865_s23 + $0x48] sm:$0xf0]  ;;  %s2688_s28 = smov 16  }
  0x56   : > { %v547_v4 = vmul.f32 %v2905_v3, %v2905_v3  ;;  %v2909_v5 = vld [vmem:[#allocation2 + $0x8] sm:$0xff]  ;;  %v2055_v33 = vor.u32 %v2333_v30, %v2052_v32  ;;  %v2042_v35 = vld [vmem:[%s2865_s23 + $0x30] sm:$0xf]  ;;  %v2331_v37 = vld [vmem:[%s2865_s23 + $0x34] sm:$0xf]  ;;  %v718_v32 = vlaneseq  ;;  %s2689_s14 = smov 32  }
  0x57   : > { %v548_v6 = vmul.f32 %v2909_v5, %v2909_v5  ;;  %687 = vmatpush.bf16.msra.mxu0 %v2067_v17  ;;  %v2332_v36 = vld [vmem:[%s2865_s23 + $0x34] sm:$0xf0]  ;;  %v2044_v39 = vld [vmem:[%s2865_s23 + $0x38] sm:$0xf0]  ;;  %v2034_v42 = vld [vmem:[%s2865_s23 + $0x20] sm:$0xf] }
  0x58   : > { %549 = vadd.xlane.f32.xlu0 %v547_v4  ;;  %v2489_v20 = vpop.eup %2488  ;;  %701 = vmatpush.bf16.msra.mxu1 %v2071_v19  ;;  %v2043_v38 = vor.u32 %v2332_v36, %v2042_v35  ;;  %v2047_v40 = vor.u32 %v2331_v37, %v2044_v39  ;;  %v2330_v43 = vld [vmem:[%s2865_s23 + $0x24] sm:$0xf0]  ;;  %v2329_v44 = vld [vmem:[%s2865_s23 + $0x24] sm:$0xf]  ;;  %v2036_v46 = vld [vmem:[%s2865_s23 + $0x28] sm:$0xf0] }
  0x59   : > { %v554_v27 = vmul.f32 128.0, %v2489_v20  ;;  %v2035_v45 = vor.u32 %v2330_v43, %v2034_v42  ;;  %v2039_v47 = vor.u32 %v2329_v44, %v2036_v46  ;;  %vm558_vm0 = vweird.f32 %v2489_v20  ;;  %v2026_v49 = vld [vmem:[%s2865_s23 + $0x10] sm:$0xf]  ;;  %v2328_v50 = vld [vmem:[%s2865_s23 + $0x14] sm:$0xf0]  ;;  %s2690_s30 = smov 96  }
  0x5a   : > { %v2327_v51 = vld [vmem:[%s2865_s23 + $0x14] sm:$0xf]  ;;  %v2027_v52 = vor.u32 %v2328_v50, %v2026_v49  ;;  %v2028_v53 = vld [vmem:[%s2865_s23 + $0x18] sm:$0xf0]  ;;  %v2018_v54 = vld [vmem:[%s2865_s23] sm:$0xf] }
  0x5b   : > { %688 = vmatpush.bf16.msra.mxu0 %v2059_v24  ;;  %v555_v34 = vsub.f32 1.0, %v554_v27  ;;  %v2326_v55 = vld [vmem:[%s2865_s23 + $0x4] sm:$0xf0]  ;;  %v2031_v56 = vor.u32 %v2327_v51, %v2028_v53  ;;  %v2325_v57 = vld [vmem:[%s2865_s23 + $0x4] sm:$0xf]  ;;  %v715_v42 = vld [vmem:[%s3227_s1 + $0x8] sm:$0xff] }
  0x5c   : > { %702 = vmatpush.bf16.msra.mxu1 %v2063_v26  ;;  %v2020_v58 = vld [vmem:[%s2865_s23 + $0x8] sm:$0xf0]  ;;  %v2019_v60 = vor.u32 %v2326_v55, %v2018_v54  ;;  %v545_v15 = vld [vmem:[%s518_s26] sm:$0x1]  ;;  %v717_v43 = vld [vmem:[%s3228_s2 + $0x8] sm:$0xff]  ;;  %s2691_s13 = smov 64  }
  0x5d   : > { %v556_v41 = vmul.f32 %v2489_v20, %v555_v34  ;;  %v2023_v61 = vor.u32 %v2325_v57, %v2020_v58  ;;  %v546_v17 = vunpack.c.l.bf16 %v545_v15  ;;  %vm819_vm8 = vcmask 261120   ;;  %p2316_p11 = scmp.ne.s32.totalorder %s2778_s25, 1 }
  0x5e   : > { %vm939_vm10 = vcmask 130048  }
  0x5f   : > { %689 = vmatpush.bf16.msra.mxu0 %v2051_v31  ;;  %v557_v48 = vadd.f32 %v2489_v20, %v556_v41  ;;  %v586_v22 = vperm.slane %v546_v17, 0  ;;  %v714_v41 = vld [vmem:[%s3227_s1] sm:$0xff] }
  0x60   : > { %551 = vadd.xlane.f32.xlu0 %v548_v6  ;;  %703 = vmatpush.bf16.msra.mxu1 %v2055_v33  ;;  %v2957_v33 = vand.u32 127, %v718_v32 }
  0x61   : > { %v2945_v59 = vsel %vm558_vm0, %v2489_v20, %v557_v48 }
  0x62   : > { %v724_v35 = vand.u32 31, %v2957_v33 }
  0x63   : > { %690 = vmatpush.bf16.msra.mxu0 %v2043_v38  ;;  %v716_v38 = vld [vmem:[%s3228_s2] sm:$0xff] }
  0x64   : > { %704 = vmatpush.bf16.msra.mxu1 %v2047_v40  ;;  %vm2960_vm7 = vcmp.lt.s32.totalorder %v724_v35, 16 }
  0x67   : > { %691 = vmatpush.bf16.msra.mxu0 %v2035_v45 }
  0x68   : > { %705 = vmatpush.bf16.msra.mxu1 %v2039_v47 }
  0x6b   : > { %692 = vmatpush.bf16.msra.mxu0 %v2027_v52 }
  0x6c   : > { %706 = vmatpush.bf16.msra.mxu1 %v2031_v56  ;;  %v751_v56 = vld [vmem:[%s3230_s4] sm:$0xff] }
  0x6f   : > { %693 = vmatpush.bf16.msra.mxu0 %v2019_v60 }
  0x70   : > { %707 = vmatpush.bf16.msra.mxu1 %v2023_v61 }
  0xcb   : > { %v550_v62 = vpop.xlane.xlu0 %549 }
  0xcc   : > { %v560_v63 = vmul.f32 %v2945_v59, %v550_v62 }
  0xce   : > { %v562_v0 = vadd.f32 1e-06, %v560_v63  ;;  %v752_v63 = vld [vmem:[%s3230_s4 + $0x8] sm:$0xff] }
  0xd0   : > { %2490 = vrsqrt.f32 %v562_v0  ;;  %vm570_vm2 = vweird.f32 %v562_v0 }
  0xd3   : > { %v552_v1 = vpop.xlane.xlu0 %551 }
  0xd4   : > { %v561_v2 = vmul.f32 %v2945_v59, %v552_v1 }
  0xd6   : > { %v2491_v4 = vpop.eup %2490  ;;  %v563_v6 = vadd.f32 1e-06, %v561_v2 }
  0xd7   : > { %v565_v7 = vmul.f32 %v2491_v4, %v562_v0  ;;  %vm571_vm1 = vweird.f32 %v2491_v4 }
  0xd8   : > { %2492 = vrsqrt.f32 %v563_v6  ;;  %vm572_vm3 = vmor %vm570_vm2, %vm571_vm1  ;;  %vm580_vm5 = vweird.f32 %v563_v6 }
  0xd9   : > { %v566_v8 = vmul.f32 %v2491_v4, %v565_v7 }
  0xdb   : > { %v567_v9 = vmul.f32 0.5, %v566_v8 }
  0xdd   : > { %v568_v10 = vsub.f32 1.5, %v567_v9 }
  0xde   : > { %v2493_v11 = vpop.eup %2492 }
  0xdf   : > { %v575_v12 = vmul.f32 %v2493_v11, %v563_v6  ;;  %v569_v13 = vmul.f32 %v2491_v4, %v568_v10  ;;  %vm581_vm4 = vweird.f32 %v2493_v11 }
  0xe0   : > { %vm582_vm6 = vmor %vm580_vm5, %vm581_vm4 }
  0xe1   : > { %v576_v14 = vmul.f32 %v2493_v11, %v575_v12  ;;  %v573_v19 = vsel %vm572_vm3, %v2491_v4, %v569_v13 }
  0xe2   : > { %v584_v21 = vmul.f32 %v573_v19, %v2905_v3 }
  0xe3   : > { %v577_v16 = vmul.f32 0.5, %v576_v14 }
  0xe4   : > { %v587_v25 = vmul.f32 %v586_v22, %v584_v21 }
  0xe5   : > { %v578_v18 = vsub.f32 1.5, %v577_v16 }
  0xe7   : > { %v579_v20 = vmul.f32 %v2493_v11, %v578_v18 }
  0xe9   : > { %v583_v23 = vsel %vm582_vm6, %v2493_v11, %v579_v20 }
  0xea   : > { %v585_v24 = vmul.f32 %v583_v23, %v2909_v5 }
  0xec   : > { %v588_v26 = vmul.f32 %v586_v22, %v585_v24 }
  0xee   : > { %v589_v27 = vpack.c.bf16 %v588_v26, %v587_v25 }
  0xf0   : > { %694 = vmatmul.bf16.vlgmr.msra.gmra.mxu0 %v589_v27  ;;  %708 = vmatmul.bf16.vlgmr.msra.gmra.mxu1 %v589_v27 }
 0x16d   : > { %v695_v28 = vpop.f32.mrf.mxu0  ;;  %v709_v29 = vpop.f32.mrf.mxu1 }
 0x16e   : > { %753 = vrot.lane.b32.xlu0 %v709_v29, %s2687_s12  ;;  %737 = vrot.lane.b32.xlu2 %v695_v28, %s2688_s28  ;;  %v743_v47 = vmul.f32 %v714_v41, %v695_v28 }
 0x16f   : > { %733 = vrot.lane.b32.xlu1 %v695_v28, %s2687_s12 }
 0x175   : > { %v697_v30 = vpop.f32.mrf.mxu0  ;;  %v711_v31 = vpop.f32.mrf.mxu1 }
 0x176   : > { %739 = vrot.lane.b32.xlu2 %v697_v30, %s2688_s28  ;;  %v744_v48 = vmul.f32 %v715_v42, %v697_v30 }
 0x177   : > { %735 = vrot.lane.b32.xlu1 %v697_v30, %s2687_s12 }
 0x17e   : > { %757 = vrot.lane.b32.xlu2 %v709_v29, %s2688_s28 }
 0x17f   : > { %755 = vrot.lane.b32.xlu1 %v711_v31, %s2687_s12 }
 0x187   : > { %759 = vrot.lane.b32.xlu1 %v711_v31, %s2688_s28  ;;  %s3261_s28 = sld [smem:[#allocation15_spill]] }
 0x18d   : > { %v749_v58 = vld [vmem:[%s3261_s28] sm:$0xff]  ;;  %v750_v62 = vld [vmem:[%s3261_s28 + $0x8] sm:$0xff] }
 0x18e   : > { %v763_v61 = vmul.f32 %v749_v58, %v709_v29  ;;  %v764_v4 = vmul.f32 %v750_v62, %v711_v31 }
 0x1c8   : > { %v738_v34 = vpop.permute.xlu2 %737 }
 0x1d0   : > { %v740_v40 = vpop.permute.xlu2 %739 }
 0x1d8   : > { %v758_v54 = vpop.permute.xlu2 %757 }
 0x1e0   : > { %v754_v52 = vpop.permute.xlu0 %753 }
 0x1e1   : > { %v734_v36 = vpop.permute.xlu1 %733  ;;  %v761_v57 = vsel %vm2960_vm7, %v754_v52, %v758_v54 }
 0x1e2   : > { %v741_v39 = vsel %vm2960_vm7, %v734_v36, %v738_v34  ;;  %v765_v60 = vmul.f32 %v761_v57, %v751_v56 }
 0x1e3   : > { %v745_v44 = vmul.f32 %v741_v39, %v716_v38 }
 0x1e4   : > { %v767_v0 = vadd.f32 %v765_v60, %v763_v61 }
 0x1e5   : > { %v747_v50 = vadd.f32 %v745_v44, %v743_v47 }
 0x1e6   : > { %v805_v8 = vpack.c.bf16 %v767_v0, %v767_v0 }
 0x1e7   : > { %v797_v16 = vpack.c.bf16 %v747_v50, %v747_v50 }
 0x1e8   : > { %v816_v11 = vunpack.c.l.b16 %v805_v8 }
 0x1e9   : > { %v736_v45 = vpop.permute.xlu1 %735  ;;  %v811_v18 = vunpack.c.l.b16 %v797_v16 }
 0x1ea   : > { %v742_v46 = vsel %vm2960_vm7, %v736_v45, %v740_v40 }
 0x1eb   : > { %v746_v49 = vmul.f32 %v742_v46, %v717_v43 }
 0x1ed   : > { %v748_v51 = vadd.f32 %v746_v49, %v744_v48 }
 0x1ef   : > { %v2483_v53 = vpack.i.bf16 %v748_v51, %v747_v50  ;;  %v798_v14 = vpack.c.bf16 %v748_v51, %v748_v51 }
 0x1f1   : > { %v756_v55 = vpop.permute.xlu1 %755  ;;  %2484 = vrot.lane.b32.xlu0 %v2483_v53, %s2689_s14  ;;  %2469 = vrot.lane.b32.xlu2 %v2483_v53, %s2690_s30  ;;  %v812_v17 = vunpack.c.l.b16 %v798_v14 }
 0x1f3   : > { %v813_v19 = vpack.c.b16 %v812_v17, %v811_v18 }
 0x1f9   : > { %v760_v1 = vpop.permute.xlu1 %759  ;;  %2479 = vrot.lane.b32.xlu2 %v2483_v53, %s2691_s13 }
 0x1fa   : > { %v762_v2 = vsel %vm2960_vm7, %v756_v55, %v760_v1  ;;  %v923_v55 = vshrl.u32 %v718_v32, 7 }
 0x1fb   : > { %v766_v6 = vmul.f32 %v762_v2, %v752_v63 }
 0x1fc   : > { %vm925_vm9 = vcmp.le.s32.totalorder %v2957_v33, %v923_v55  ;;  %v924_v61 = vadd.s32 8, %v923_v55 }
 0x1fd   : > { %v768_v7 = vadd.f32 %v766_v6, %v764_v4 }
 0x1fe   : > { %vm926_vm11 = vcmp.le.s32.totalorder %v2957_v33, %v924_v61 }
 0x1ff   : > { %v2473_v9 = vpack.i.bf16 %v768_v7, %v767_v0  ;;  %v806_v10 = vpack.c.bf16 %v768_v7, %v768_v7 }
 0x201   : > { %2474 = vrot.lane.b32.xlu1 %v2473_v9, %s2690_s30  ;;  %v817_v12 = vunpack.c.l.b16 %v806_v10 }
 0x203   : > { %v2997_v13 = vpack.c.b16 %v817_v12, %v816_v11 }
 0x205   : > { %v824_v15 = vsel %vm819_vm8, %v2997_v13, 0 }
 0x206   : > { %833 = vmatpush.bf16.xpose.msrb.mxu0 %v824_v15  ;;  %855 = vmatpush.bf16.xpose.msrb.mxu1 %v824_v15 }
 0x20d   : > { %2080 = vmatmul.msk.bf16.vlgmr.msrb.gmra.mxu0 %vm819_vm8, %v813_v19 }
 0x24b   : > { %v2470_v20 = vpop.permute.xlu2 %2469 }
 0x24c   : > { %v2472_v21 = vunpack.i.h.bf16 %v2470_v20  ;;  %v2471_v22 = vunpack.i.l.bf16 %v2470_v20 }
 0x24e   : > { %v800_v23 = vpack.c.bf16 %v2472_v21, %v2472_v21  ;;  %v799_v24 = vpack.c.bf16 %v2471_v22, %v2471_v22 }
 0x250   : > { %v843_v25 = vunpack.c.l.b16 %v800_v23  ;;  %v842_v26 = vunpack.c.l.b16 %v799_v24 }
 0x252   : > { %v844_v27 = vpack.c.b16 %v843_v25, %v842_v26 }
 0x253   : > { %v2480_v28 = vpop.permute.xlu2 %2479 }
 0x254   : > { %2081 = vmatmul.msk.bf16.vlgmr.msrb.gmra.mxu1 %vm819_vm8, %v844_v27  ;;  %v2482_v35 = vunpack.i.h.bf16 %v2480_v28  ;;  %v2481_v36 = vunpack.i.l.bf16 %v2480_v28 }
 0x256   : > { %v802_v43 = vpack.c.bf16 %v2482_v35, %v2482_v35  ;;  %v801_v44 = vpack.c.bf16 %v2481_v36, %v2481_v36 }
 0x258   : > { %v865_v49 = vunpack.c.l.b16 %v802_v43  ;;  %v864_v50 = vunpack.c.l.b16 %v801_v44 }
 0x25a   : > { %v866_v53 = vpack.c.b16 %v865_v49, %v864_v50 }
 0x263   : > { %v2485_v29 = vpop.permute.xlu0 %2484 }
 0x264   : > { %v2487_v37 = vunpack.i.h.bf16 %v2485_v29  ;;  %v2486_v38 = vunpack.i.l.bf16 %v2485_v29 }
 0x266   : > { %v804_v45 = vpack.c.bf16 %v2487_v37, %v2487_v37  ;;  %v803_v46 = vpack.c.bf16 %v2486_v38, %v2486_v38 }
 0x268   : > { %v895_v51 = vunpack.c.l.b16 %v804_v45  ;;  %v894_v52 = vunpack.c.l.b16 %v803_v46 }
 0x26a   : > { %v896_v54 = vpack.c.b16 %v895_v51, %v894_v52 }
 0x273   : > { %v2475_v30 = vpop.permute.xlu1 %2474 }
 0x274   : > { %v2477_v31 = vunpack.i.h.bf16 %v2475_v30  ;;  %v2476_v34 = vunpack.i.l.bf16 %v2475_v30 }
 0x276   : > { %v808_v39 = vpack.c.bf16 %v2477_v31, %v2477_v31  ;;  %v807_v40 = vpack.c.bf16 %v2476_v34, %v2476_v34 }
 0x278   : > { %v870_v41 = vunpack.c.l.b16 %v808_v39  ;;  %v869_v42 = vunpack.c.l.b16 %v807_v40 }
 0x27a   : > { %v3003_v47 = vpack.c.b16 %v870_v41, %v869_v42 }
 0x27c   : > { %v876_v48 = vsel %vm819_vm8, %v3003_v47, 0 }
 0x27d   : > { %885 = vmatpush.bf16.xpose.msra.mxu2 %v876_v48  ;;  %907 = vmatpush.bf16.xpose.msra.mxu3 %v876_v48 }
 0x284   : > { %2082 = vmatmul.msk.bf16.vlgmr.msra.gmra.mxu2 %vm819_vm8, %v866_v53  ;;  %2083 = vmatmul.msk.bf16.vlgmr.msra.gmra.mxu3 %vm819_vm8, %v896_v54 }
 0x28a   : > { %v835_v56 = vpop.f32.mrf.mxu0 }
 0x28b   : > { %v914_v57 = vmul.f32 0.17677669, %v835_v56 }
 0x28d   : > { %v931_v58 = vsel %vm925_vm9, %v914_v57, -1e+30 }
 0x28e   : > { %v940_v60 = vsel %vm939_vm10, %v931_v58, -inf }
 0x28f   : > { %941 = vmax.xlane.f32.xlu1 %v940_v60 }
 0x292   : > { %v837_v62 = vpop.f32.mrf.mxu0 }
 0x293   : > { %v915_v63 = vmul.f32 0.17677669, %v837_v62 }
 0x295   : > { %v932_v0 = vsel %vm926_vm11, %v915_v63, -1e+30 }
 0x296   : > { %v943_v32 = vsel %vm939_vm10, %v932_v0, -inf }
 0x297   : > { %944 = vmax.xlane.f32.xlu2 %v943_v32 }
 0x2d1   : > { %v857_v1 = vpop.f32.mrf.mxu1 }
 0x2d2   : > { %v916_v2 = vmul.f32 0.17677669, %v857_v1 }
 0x2d4   : > { %v933_v4 = vsel %vm925_vm9, %v916_v2, -1e+30 }
 0x2d5   : > { %v946_v6 = vsel %vm939_vm10, %v933_v4, -inf }
 0x2d6   : > { %947 = vmax.xlane.f32.xlu0 %v946_v6 }
 0x2d9   : > { %v859_v7 = vpop.f32.mrf.mxu1 }
 0x2da   : > { %v917_v8 = vmul.f32 0.17677669, %v859_v7 }
 0x2dc   : > { %v934_v9 = vsel %vm926_vm11, %v917_v8, -1e+30 }
 0x2dd   : > { %v949_v10 = vsel %vm939_vm10, %v934_v9, -inf }
 0x2de   : > { %950 = vmax.xlane.f32.xlu2 %v949_v10 }
 0x2f6   : > { %1025 = vrot.lane.b32.xlu2 %v2997_v13, %s2691_s13 }
 0x302   : > { %v942_v18 = vpop.xlane.xlu1 %941 }
 0x303   : > { %v964_v22 = vsub.f32 %v931_v58, %v942_v18 }
 0x305   : > { %v972_v27 = vmul.f32 1.442695, %v964_v22 }
 0x307   : > { %v887_v11 = vpop.f32.mrf.mxu2  ;;  %v909_v12 = vpop.f32.mrf.mxu3  ;;  %2494 = vpow2.f32 %v972_v27 }
 0x308   : > { %v918_v14 = vmul.f32 0.17677669, %v887_v11  ;;  %v920_v17 = vmul.f32 0.17677669, %v909_v12 }
 0x30a   : > { %v3028_v15 = vsel %vm925_vm9, %v918_v14, -1e+30  ;;  %v3034_v21 = vsel %vm925_vm9, %v920_v17, -1e+30  ;;  %v945_v28 = vpop.xlane.xlu2 %944 }
 0x30b   : > { %v952_v16 = vsel %vm939_vm10, %v3028_v15, -inf  ;;  %v958_v25 = vsel %vm939_vm10, %v3034_v21, -inf  ;;  %v965_v30 = vsub.f32 %v932_v0, %v945_v28  ;;  %v2342_v28 = vld [vmem:[%s2889_s15 + $0x8] sm:$0xff] }
 0x30c   : > { %953 = vmax.xlane.f32.xlu1 %v952_v16 }
 0x30d   : > { %v974_v34 = vmul.f32 1.442695, %v965_v30  ;;  %v2495_v35 = vpop.eup %2494  ;;  %v2344_v30 = vld [vmem:[%s2889_s15 + $0x18] sm:$0xff] }
 0x30e   : > { %v988_v36 = vsel %vm939_vm10, %v2495_v35, 0.0  ;;  %v1012_v46 = vpack.c.bf16 %v2495_v35, %v2495_v35 }
 0x30f   : > { %v889_v19 = vpop.f32.mrf.mxu2  ;;  %v911_v13 = vpop.f32.mrf.mxu3  ;;  %2496 = vpow2.f32 %v974_v34  ;;  %v2343_v34 = vld [vmem:[%s2889_s15 + $0x10] sm:$0xff] }
 0x310   : > { %v919_v20 = vmul.f32 0.17677669, %v889_v19  ;;  %v921_v26 = vmul.f32 0.17677669, %v911_v13  ;;  %v1022_v50 = vunpack.c.l.b16 %v1012_v46 }
 0x312   : > { %v936_v23 = vsel %vm926_vm11, %v919_v20, -1e+30  ;;  %v938_v29 = vsel %vm926_vm11, %v921_v26, -1e+30 }
 0x313   : > { %v955_v24 = vsel %vm939_vm10, %v936_v23, -inf  ;;  %v961_v31 = vsel %vm939_vm10, %v938_v29, -inf }
 0x314   : > { %956 = vmax.xlane.f32.xlu0 %v955_v24  ;;  %959 = vmax.xlane.f32.xlu1 %v958_v25 }
 0x315   : > { %v2497_v37 = vpop.eup %2496 }
 0x316   : > { %v991_v38 = vsel %vm939_vm10, %v2497_v37, 0.0  ;;  %v1013_v43 = vpack.c.bf16 %v2497_v37, %v2497_v37 }
 0x318   : > { %v1023_v49 = vunpack.c.l.b16 %v1013_v43 }
 0x31a   : > { %v1024_v52 = vpack.c.b16 %v1023_v49, %v1022_v50 }
 0x31c   : > { %962 = vmax.xlane.f32.xlu0 %v961_v31 }
 0x324   : > { %989 = vadd.xlane.f32.xlu0 %v988_v36 }
 0x32c   : > { %992 = vadd.xlane.f32.xlu0 %v991_v38 }
 0x32d   : > { %1072 = vrot.lane.b32.xlu1 %v3003_v47, %s2691_s13 }
 0x349   : > { %v948_v33 = vpop.xlane.xlu0 %947 }
 0x34a   : > { %v966_v39 = vsub.f32 %v933_v4, %v948_v33 }
 0x34c   : > { %v976_v40 = vmul.f32 1.442695, %v966_v39 }
 0x34e   : > { %2498 = vpow2.f32 %v976_v40 }
 0x351   : > { %v951_v41 = vpop.xlane.xlu2 %950 }
 0x352   : > { %v967_v42 = vsub.f32 %v934_v9, %v951_v41 }
 0x354   : > { %v2499_v44 = vpop.eup %2498  ;;  %v978_v45 = vmul.f32 1.442695, %v967_v42 }
 0x355   : > { %v994_v48 = vsel %vm939_vm10, %v2499_v44, 0.0  ;;  %v1014_v47 = vpack.c.bf16 %v2499_v44, %v2499_v44 }
 0x356   : > { %2500 = vpow2.f32 %v978_v45  ;;  %995 = vadd.xlane.f32.xlu2 %v994_v48 }
 0x357   : > { %v1047_v56 = vunpack.c.l.b16 %v1014_v47 }
 0x359   : > { %v1026_v51 = vpop.permute.xlu2 %1025 }
 0x35a   : > { %1038 = vmatpush.bf16.msrb.mxu2 %v1026_v51  ;;  %1060 = vmatpush.bf16.msrb.mxu3 %v1026_v51 }
 0x35c   : > { %v2501_v53 = vpop.eup %2500 }
 0x35d   : > { %v1015_v54 = vpack.c.bf16 %v2501_v53, %v2501_v53  ;;  %2084 = vmatmul.msk.bf16.vlgmr.msrb.gmra.mxu2 %vm939_vm10, %v1024_v52  ;;  %v997_v55 = vsel %vm939_vm10, %v2501_v53, 0.0 }
 0x35e   : > { %998 = vadd.xlane.f32.xlu0 %v997_v55  ;;  %1180 = vmatpush.bf16.msra.mxu2 %v2342_v28 }
 0x35f   : > { %v1048_v57 = vunpack.c.l.b16 %v1015_v54  ;;  %1214 = vmatpush.bf16.msra.mxu3 %v2344_v30 }
 0x361   : > { %v1049_v58 = vpack.c.b16 %v1048_v57, %v1047_v56 }
 0x363   : > { %2085 = vmatmul.msk.bf16.vlgmr.msrb.gmra.mxu3 %vm939_vm10, %v1049_v58 }
 0x364   : > { %1215 = vmatpush.bf16.msra.mxu3 %v2343_v34 }
 0x37f   : > { %v954_v60 = vpop.xlane.xlu1 %953 }
 0x380   : > { %v968_v61 = vsub.f32 %v3028_v15, %v954_v60  ;;  %v2346_v60 = vld [vmem:[%s2889_s15 + $0x28] sm:$0xff] }
 0x382   : > { %v980_v62 = vmul.f32 1.442695, %v968_v61  ;;  %v2348_v61 = vld [vmem:[%s2889_s15 + $0x38] sm:$0xff] }
 0x384   : > { %2502 = vpow2.f32 %v980_v62 }
 0x387   : > { %v957_v63 = vpop.xlane.xlu0 %956  ;;  %v960_v0 = vpop.xlane.xlu1 %959 }
 0x388   : > { %v969_v32 = vsub.f32 %v936_v23, %v957_v63  ;;  %v970_v1 = vsub.f32 %v3034_v21, %v960_v0  ;;  %v2345_v63 = vld [vmem:[%s2889_s15 + $0x20] sm:$0xff]  ;;  %v2347_v0 = vld [vmem:[%s2889_s15 + $0x30] sm:$0xff] }
 0x38a   : > { %v2503_v2 = vpop.eup %2502  ;;  %v984_v4 = vmul.f32 1.442695, %v970_v1  ;;  %v982_v7 = vmul.f32 1.442695, %v969_v32 }
 0x38b   : > { %v1000_v6 = vsel %vm939_vm10, %v2503_v2, 0.0  ;;  %v1016_v17 = vpack.c.bf16 %v2503_v2, %v2503_v2 }
 0x38c   : > { %1001 = vadd.xlane.f32.xlu1 %v1000_v6  ;;  %2504 = vpow2.f32 %v984_v4 }
 0x38d   : > { %2506 = vpow2.f32 %v982_v7  ;;  %v1069_v22 = vunpack.c.l.b16 %v1016_v17 }
 0x38f   : > { %v963_v8 = vpop.xlane.xlu0 %962 }
 0x390   : > { %v971_v9 = vsub.f32 %v938_v29, %v963_v8  ;;  %v2341_v29 = vld [vmem:[%s2889_s15] sm:$0xff] }
 0x391   : > { %1181 = vmatpush.bf16.msra.mxu2 %v2341_v29 }
 0x392   : > { %v986_v10 = vmul.f32 1.442695, %v971_v9  ;;  %v2505_v11 = vpop.eup %2504 }
 0x393   : > { %v1006_v12 = vsel %vm939_vm10, %v2505_v11, 0.0  ;;  %v2507_v14 = vpop.eup %2506  ;;  %v1018_v18 = vpack.c.bf16 %v2505_v11, %v2505_v11 }
 0x394   : > { %2508 = vpow2.f32 %v986_v10  ;;  %1007 = vadd.xlane.f32.xlu0 %v1006_v12  ;;  %v1017_v15 = vpack.c.bf16 %v2507_v14, %v2507_v14  ;;  %v1003_v20 = vsel %vm939_vm10, %v2507_v14, 0.0 }
 0x395   : > { %v1094_v23 = vunpack.c.l.b16 %v1018_v18 }
 0x396   : > { %v1070_v21 = vunpack.c.l.b16 %v1017_v15 }
 0x397   : > { %v990_v31 = vpop.xlane.xlu0 %989 }
 0x398   : > { %v1071_v25 = vpack.c.b16 %v1070_v21, %v1069_v22  ;;  %2510 = vrcp.f32 %v990_v31 }
 0x39a   : > { %v2509_v16 = vpop.eup %2508 }
 0x39b   : > { %v1019_v19 = vpack.c.bf16 %v2509_v16, %v2509_v16  ;;  %v1009_v27 = vsel %vm939_vm10, %v2509_v16, 0.0 }
 0x39c   : > { %1004 = vadd.xlane.f32.xlu0 %v1003_v20 }
 0x39d   : > { %v1095_v13 = vunpack.c.l.b16 %v1019_v19 }
 0x39e   : > { %v2511_v38 = vpop.eup %2510 }
 0x39f   : > { %v1073_v24 = vpop.permute.xlu1 %1072  ;;  %v1096_v26 = vpack.c.b16 %v1095_v13, %v1094_v23  ;;  %v993_v35 = vpop.xlane.xlu0 %992 }
 0x3a0   : > { %1085 = vmatpush.bf16.msra.mxu0 %v1073_v24  ;;  %1107 = vmatpush.bf16.msra.mxu1 %v1073_v24  ;;  %2512 = vrcp.f32 %v993_v35 }
 0x3a3   : > { %2086 = vmatmul.msk.bf16.vlgmr.msra.gmra.mxu0 %vm939_vm10, %v1071_v25  ;;  %2087 = vmatmul.msk.bf16.vlgmr.msra.gmra.mxu1 %vm939_vm10, %v1096_v26 }
 0x3a4   : > { %1010 = vadd.xlane.f32.xlu0 %v1009_v27  ;;  %1248 = vmatpush.bf16.msrb.mxu0 %v2346_v60 }
 0x3a5   : > { %1282 = vmatpush.bf16.msrb.mxu1 %v2348_v61  ;;  %v2224_v61 = vld [vmem:[%s2899_s17 + $0xd0] sm:$0xf0] }
 0x3a6   : > { %v2513_v41 = vpop.eup %2512 }
 0x3a8   : > { %1249 = vmatpush.bf16.msrb.mxu0 %v2345_v63  ;;  %v2376_v63 = vld [vmem:[%s2899_s17 + $0xd4] sm:$0xf0] }
 0x3a9   : > { %1283 = vmatpush.bf16.msrb.mxu1 %v2347_v0 }
 0x3c9   : > { %v996_v37 = vpop.xlane.xlu2 %995 }
 0x3ca   : > { %2514 = vrcp.f32 %v996_v37 }
 0x3d0   : > { %v2515_v45 = vpop.eup %2514 }
 0x3d1   : > { %v999_v33 = vpop.xlane.xlu0 %998 }
 0x3d2   : > { %2516 = vrcp.f32 %v999_v33 }
 0x3d8   : > { %v2517_v51 = vpop.eup %2516 }
 0x3e0   : > { %v1040_v36 = vpop.f32.mrf.mxu2 }
 0x3e1   : > { %v1122_v39 = vmul.f32 %v2511_v38, %v1040_v36 }
 0x3e3   : > { %v1130_v43 = vpack.c.bf16 %v1122_v39, %v1122_v39 }
 0x3e5   : > { %v1156_v49 = vunpack.c.l.b16 %v1130_v43 }
 0x3e6   : > { %v1062_v40 = vpop.f32.mrf.mxu3 }
 0x3e7   : > { %v1124_v46 = vmul.f32 %v2515_v45, %v1062_v40  ;;  %v2238_v45 = vld [vmem:[%s2899_s17 + $0xe0] sm:$0xf] }
 0x3e8   : > { %v1042_v42 = vpop.f32.mrf.mxu2 }
 0x3e9   : > { %v1123_v44 = vmul.f32 %v2513_v41, %v1042_v42  ;;  %v1132_v52 = vpack.c.bf16 %v1124_v46, %v1124_v46  ;;  %v2379_v46 = vld [vmem:[%s2899_s17 + $0xec] sm:$0xf0] }
 0x3eb   : > { %v1131_v48 = vpack.c.bf16 %v1123_v44, %v1123_v44  ;;  %v1190_v56 = vunpack.c.l.b16 %v1132_v52 }
 0x3ed   : > { %v1157_v50 = vunpack.c.l.b16 %v1131_v48  ;;  %v2377_v48 = vld [vmem:[%s2899_s17 + $0xe4] sm:$0xf] }
 0x3ee   : > { %v1064_v47 = vpop.f32.mrf.mxu3 }
 0x3ef   : > { %v1158_v53 = vpack.c.b16 %v1157_v50, %v1156_v49  ;;  %v1125_v54 = vmul.f32 %v2517_v51, %v1064_v47  ;;  %v2239_v49 = vor.u32 %v2379_v46, %v2238_v45  ;;  %v2240_v50 = vld [vmem:[%s2899_s17 + $0xf0] sm:$0xf0]  ;;  %v2246_v51 = vld [vmem:[%s2899_s17 + $0xe8] sm:$0xf]  ;;  %v2380_v47 = vld [vmem:[%s2899_s17 + $0xf4] sm:$0xf0] }
 0x3f0   : > { %v2243_v52 = vor.u32 %v2377_v48, %v2240_v50  ;;  %v2359_v45 = vld [vmem:[%s2899_s17 + $0x4c] sm:$0xf0]  ;;  %v2357_v46 = vld [vmem:[%s2899_s17 + $0x44] sm:$0xf]  ;;  %v2166_v50 = vld [vmem:[%s2899_s17 + $0x48] sm:$0xf] }
 0x3f1   : > { %v1133_v55 = vpack.c.bf16 %v1125_v54, %v1125_v54  ;;  %2096 = vmatmul.msk.bf16.vlgmr.msra.gmra.mxu2 %vm819_vm8, %v1158_v53  ;;  %v2378_v53 = vld [vmem:[%s2899_s17 + $0xec] sm:$0xf]  ;;  %v2248_v54 = vld [vmem:[%s2899_s17 + $0xf8] sm:$0xf0] }
 0x3f2   : > { %1528 = vmatpush.bf16.msrb.mxu2 %v2239_v49  ;;  %1542 = vmatpush.bf16.msrb.mxu3 %v2243_v52  ;;  %v2160_v49 = vld [vmem:[%s2899_s17 + $0x50] sm:$0xf0] }
 0x3f3   : > { %v1191_v57 = vunpack.c.l.b16 %v1133_v55  ;;  %v2251_v55 = vor.u32 %v2378_v53, %v2248_v54  ;;  %v2168_v53 = vld [vmem:[%s2899_s17 + $0x58] sm:$0xf0] }
 0x3f5   : > { %v1192_v58 = vpack.c.b16 %v1191_v57, %v1190_v56  ;;  %v2222_v56 = vld [vmem:[%s2899_s17 + $0xc0] sm:$0xf]  ;;  %v2375_v57 = vld [vmem:[%s2899_s17 + $0xcc] sm:$0xf0]  ;;  %1570 = vmatpush.bf16.msra.mxu1 %v2251_v55 }
 0x3f6   : > { %v2223_v60 = vor.u32 %v2375_v57, %v2222_v56  ;;  %v2142_v55 = vld [vmem:[%s2899_s17 + $0x20] sm:$0xf]  ;;  %v2355_v56 = vld [vmem:[%s2899_s17 + $0x2c] sm:$0xf0]  ;;  %v2353_v57 = vld [vmem:[%s2899_s17 + $0x24] sm:$0xf] }
 0x3f7   : > { %2105 = vmatmul.msk.bf16.vlgmr.msra.gmra.mxu3 %vm819_vm8, %v1192_v58  ;;  %v2373_v58 = vld [vmem:[%s2899_s17 + $0xc4] sm:$0xf] }
 0x3f8   : > { %v2227_v0 = vor.u32 %v2373_v58, %v2224_v61  ;;  %1529 = vmatpush.bf16.msrb.mxu2 %v2223_v60  ;;  %v2143_v58 = vor.u32 %v2355_v56, %v2142_v55  ;;  %v2144_v60 = vld [vmem:[%s2899_s17 + $0x30] sm:$0xf0]  ;;  %v2150_v61 = vld [vmem:[%s2899_s17 + $0x28] sm:$0xf] }
 0x3f9   : > { %v2384_v56 = vld [vmem:[%s2871_s20 + $0x18] sm:$0xff] }
 0x3fa   : > { %1543 = vmatpush.bf16.msrb.mxu3 %v2227_v0 }
 0x3ff   : > { %v1002_v1 = vpop.xlane.xlu1 %1001 }
 0x400   : > { %2518 = vrcp.f32 %v1002_v1  ;;  %v2374_v1 = vld [vmem:[%s2899_s17 + $0xcc] sm:$0xf] }
 0x406   : > { %v2519_v7 = vpop.eup %2518 }
 0x407   : > { %v1008_v62 = vpop.xlane.xlu0 %1007 }
 0x408   : > { %2520 = vrcp.f32 %v1008_v62  ;;  %v2230_v62 = vld [vmem:[%s2899_s17 + $0xc8] sm:$0xf] }
 0x40e   : > { %v2521_v8 = vpop.eup %2520 }
 0x40f   : > { %v1005_v32 = vpop.xlane.xlu0 %1004 }
 0x410   : > { %2522 = vrcp.f32 %v1005_v32  ;;  %v2231_v32 = vor.u32 %v2376_v63, %v2230_v62  ;;  %v2356_v62 = vld [vmem:[%s2899_s17 + $0x34] sm:$0xf0]  ;;  %v2147_v63 = vor.u32 %v2353_v57, %v2144_v60  ;;  %v2392_v57 = vld [vmem:[%s2871_s20 + $0x58] sm:$0xff] }
 0x411   : > { %v2151_v0 = vor.u32 %v2356_v62, %v2150_v61 }
 0x416   : > { %v2523_v11 = vpop.eup %2522 }
 0x417   : > { %v1011_v2 = vpop.xlane.xlu0 %1010 }
 0x418   : > { %2524 = vrcp.f32 %v1011_v2  ;;  %v2232_v2 = vld [vmem:[%s2899_s17 + $0xd8] sm:$0xf0] }
 0x41e   : > { %v2525_v12 = vpop.eup %2524 }
 0x420   : > { %v1087_v4 = vpop.f32.mrf.mxu0  ;;  %v1109_v6 = vpop.f32.mrf.mxu1 }
 0x421   : > { %v1126_v9 = vmul.f32 %v2519_v7, %v1087_v4  ;;  %v1128_v10 = vmul.f32 %v2521_v8, %v1109_v6  ;;  %v2235_v4 = vor.u32 %v2374_v1, %v2232_v2  ;;  %v2206_v6 = vld [vmem:[%s2899_s17 + $0xa0] sm:$0xf]  ;;  %v2371_v7 = vld [vmem:[%s2899_s17 + $0xac] sm:$0xf0]  ;;  %v2369_v8 = vld [vmem:[%s2899_s17 + $0xa4] sm:$0xf] }
 0x422   : > { %v2152_v1 = vld [vmem:[%s2899_s17 + $0x38] sm:$0xf0] }
 0x423   : > { %v1134_v16 = vpack.c.bf16 %v1126_v9, %v1126_v9  ;;  %v1136_v17 = vpack.c.bf16 %v1128_v10, %v1128_v10  ;;  %1571 = vmatpush.bf16.msra.mxu1 %v2235_v4  ;;  %v2207_v9 = vor.u32 %v2371_v7, %v2206_v6  ;;  %v2208_v10 = vld [vmem:[%s2899_s17 + $0xb0] sm:$0xf0]  ;;  %v2126_v4 = vld [vmem:[%s2899_s17] sm:$0xf]  ;;  %v2351_v6 = vld [vmem:[%s2899_s17 + $0xc] sm:$0xf0] }
 0x424   : > { %v2349_v7 = vld [vmem:[%s2899_s17 + $0x4] sm:$0xf] }
 0x425   : > { %v1224_v13 = vunpack.c.l.b16 %v1134_v16  ;;  %v1258_v22 = vunpack.c.l.b16 %v1136_v17  ;;  %v2370_v16 = vld [vmem:[%s2899_s17 + $0xac] sm:$0xf]  ;;  %v2216_v17 = vld [vmem:[%s2899_s17 + $0xb8] sm:$0xf0]  ;;  %1530 = vmatpush.bf16.msrb.mxu2 %v2207_v9  ;;  %v2127_v9 = vor.u32 %v2351_v6, %v2126_v4 }
 0x426   : > { %v2390_v4 = vld [vmem:[%s2871_s20 + $0x48] sm:$0xff] }
 0x428   : > { %v1089_v14 = vpop.f32.mrf.mxu0  ;;  %v1111_v15 = vpop.f32.mrf.mxu1 }
 0x429   : > { %v1127_v18 = vmul.f32 %v2523_v11, %v1089_v14  ;;  %v1129_v19 = vmul.f32 %v2525_v12, %v1111_v15  ;;  %v2214_v11 = vld [vmem:[%s2899_s17 + $0xa8] sm:$0xf]  ;;  %v2372_v12 = vld [vmem:[%s2899_s17 + $0xb4] sm:$0xf0]  ;;  %v2211_v14 = vor.u32 %v2369_v8, %v2208_v10  ;;  %v2128_v10 = vld [vmem:[%s2899_s17 + $0x10] sm:$0xf0] }
 0x42a   : > { %v2215_v15 = vor.u32 %v2372_v12, %v2214_v11  ;;  %v2134_v11 = vld [vmem:[%s2899_s17 + $0x8] sm:$0xf]  ;;  %v2352_v12 = vld [vmem:[%s2899_s17 + $0x14] sm:$0xf0] }
 0x42b   : > { %v1135_v20 = vpack.c.bf16 %v1127_v18, %v1127_v18  ;;  %v1137_v21 = vpack.c.bf16 %v1129_v19, %v1129_v19  ;;  %v2219_v18 = vor.u32 %v2370_v16, %v2216_v17  ;;  %1544 = vmatpush.bf16.msrb.mxu3 %v2211_v14  ;;  %v2190_v19 = vld [vmem:[%s2899_s17 + $0x80] sm:$0xf]  ;;  %v2135_v16 = vor.u32 %v2352_v12, %v2134_v11  ;;  %v2350_v17 = vld [vmem:[%s2899_s17 + $0xc] sm:$0xf] }
 0x42d   : > { %v1225_v23 = vunpack.c.l.b16 %v1135_v20  ;;  %v1259_v24 = vunpack.c.l.b16 %v1137_v21  ;;  %v2367_v20 = vld [vmem:[%s2899_s17 + $0x8c] sm:$0xf0]  ;;  %v2365_v21 = vld [vmem:[%s2899_s17 + $0x84] sm:$0xf]  ;;  %1572 = vmatpush.bf16.msra.mxu1 %v2219_v18  ;;  %v2136_v18 = vld [vmem:[%s2899_s17 + $0x18] sm:$0xf0] }
 0x42f   : > { %v1226_v25 = vpack.c.b16 %v1225_v23, %v1224_v13  ;;  %v1260_v26 = vpack.c.b16 %v1259_v24, %v1258_v22  ;;  %v2191_v13 = vor.u32 %v2367_v20, %v2190_v19  ;;  %v2192_v22 = vld [vmem:[%s2899_s17 + $0x90] sm:$0xf0]  ;;  %v2198_v23 = vld [vmem:[%s2899_s17 + $0x88] sm:$0xf]  ;;  %v2368_v24 = vld [vmem:[%s2899_s17 + $0x94] sm:$0xf0]  ;;  %v2139_v19 = vor.u32 %v2350_v17, %v2136_v18 }
 0x431   : > { %2114 = vmatmul.msk.bf16.vlgmr.msrb.gmra.mxu0 %vm819_vm8, %v1226_v25  ;;  %2123 = vmatmul.msk.bf16.vlgmr.msrb.gmra.mxu1 %vm819_vm8, %v1260_v26  ;;  %v2195_v25 = vor.u32 %v2365_v21, %v2192_v22  ;;  %v2199_v26 = vor.u32 %v2368_v24, %v2198_v23 }
 0x432   : > { %1531 = vmatpush.bf16.msrb.mxu2 %v2191_v13 }
 0x433   : > { %1545 = vmatpush.bf16.msrb.mxu3 %v2195_v25 }
 0x474   : > { %v1183_v28 = vpop.f32.mrf.mxu2 }
 0x47a   : > { %v1217_v27 = vpop.f32.mrf.mxu3 }
 0x47b   : > { %v1290_v29 = vadd.f32 %v1217_v27, %v1183_v28  ;;  %v2366_v27 = vld [vmem:[%s2899_s17 + $0x8c] sm:$0xf]  ;;  %v2200_v28 = vld [vmem:[%s2899_s17 + $0x98] sm:$0xf0] }
 0x47c   : > { %v1185_v38 = vpop.f32.mrf.mxu2 }
 0x482   : > { %v1219_v36 = vpop.f32.mrf.mxu3 }
 0x483   : > { %v1293_v33 = vadd.f32 %v1219_v36, %v1185_v38  ;;  %v2176_v36 = vld [vmem:[%s2899_s17 + $0x70] sm:$0xf0]  ;;  %v2182_v38 = vld [vmem:[%s2899_s17 + $0x68] sm:$0xf] }
 0x4ae   : > { %v1251_v30 = vpop.f32.mrf.mxu0  ;;  %v1285_v31 = vpop.f32.mrf.mxu1 }
 0x4af   : > { %v1291_v34 = vadd.f32 %v1290_v29, %v1251_v30  ;;  %v2203_v29 = vor.u32 %v2366_v27, %v2200_v28  ;;  %v2174_v30 = vld [vmem:[%s2899_s17 + $0x60] sm:$0xf] }
 0x4b1   : > { %v1292_v35 = vadd.f32 %v1291_v34, %v1285_v31  ;;  %v2363_v31 = vld [vmem:[%s2899_s17 + $0x6c] sm:$0xf0]  ;;  %v2361_v34 = vld [vmem:[%s2899_s17 + $0x64] sm:$0xf]  ;;  %1573 = vmatpush.bf16.msra.mxu1 %v2203_v29 }
 0x4b3   : > { %v3073_v37 = vadd.f32 %v1292_v35, %v2905_v3  ;;  %v2175_v35 = vor.u32 %v2363_v31, %v2174_v30 }
 0x4b5   : > { %v1300_v39 = vmul.f32 %v3073_v37, %v3073_v37  ;;  %1532 = vmatpush.bf16.msrb.mxu2 %v2175_v35 }
 0x4b6   : > { %v1253_v40 = vpop.f32.mrf.mxu0  ;;  %v1287_v42 = vpop.f32.mrf.mxu1 }
 0x4b7   : > { %v1294_v41 = vadd.f32 %v1293_v33, %v1253_v40  ;;  %1302 = vadd.xlane.f32.xlu0 %v1300_v39  ;;  %v2364_v33 = vld [vmem:[%s2899_s17 + $0x74] sm:$0xf0]  ;;  %v2179_v39 = vor.u32 %v2361_v34, %v2176_v36  ;;  %v1298_v34 = vld [vmem:[%s526_s21] sm:$0x1]  ;;  %s3266_s21 = sld [smem:[#allocation16_spill]] (!%p2316_p11) }
 0x4b8   : > { %v2183_v40 = vor.u32 %v2364_v33, %v2182_v38  ;;  %v1299_v36 = vunpack.c.l.bf16 %v1298_v34 }
 0x4b9   : > { %v1295_v43 = vadd.f32 %v1294_v41, %v1287_v42  ;;  %v2362_v41 = vld [vmem:[%s2899_s17 + $0x6c] sm:$0xf]  ;;  %v2184_v42 = vld [vmem:[%s2899_s17 + $0x78] sm:$0xf0]  ;;  %1546 = vmatpush.bf16.msrb.mxu3 %v2179_v39 }
 0x4bb   : > { %v3078_v44 = vadd.f32 %v1295_v43, %v2909_v5  ;;  %v2247_v5 = vor.u32 %v2380_v47, %v2246_v51  ;;  %v2187_v43 = vor.u32 %v2362_v41, %v2184_v42  ;;  %v2360_v51 = vld [vmem:[%s2899_s17 + $0x54] sm:$0xf0]  ;;  %v2163_v47 = vor.u32 %v2357_v46, %v2160_v49  ;;  %v2396_v49 = vld [vmem:[%s2871_s20 + $0x78] sm:$0xff] }
 0x4bc   : > { %v2167_v52 = vor.u32 %v2360_v51, %v2166_v50  ;;  %v1332_v41 = vperm.slane %v1299_v36, 0  ;;  %v2387_v50 = vld [vmem:[%s2871_s20 + $0x30] sm:$0xff] }
 0x4bd   : > { %v1301_v3 = vmul.f32 %v3078_v44, %v3078_v44  ;;  %1556 = vmatpush.bf16.msra.mxu0 %v2247_v5  ;;  %1574 = vmatpush.bf16.msra.mxu1 %v2187_v43  ;;  %v2358_v5 = vld [vmem:[%s2899_s17 + $0x4c] sm:$0xf]  ;;  %v2395_v51 = vld [vmem:[%s2871_s20 + $0x70] sm:$0xff] }
 0x4be   : > { %v2171_v54 = vor.u32 %v2358_v5, %v2168_v53  ;;  %1547 = vmatpush.bf16.msrb.mxu3 %v2163_v47  ;;  %v2386_v47 = vld [vmem:[%s2871_s20 + $0x28] sm:$0xff]  ;;  %v2385_v5 = vld [vmem:[%s2871_s20 + $0x20] sm:$0xff] }
 0x4bf   : > { %1304 = vadd.xlane.f32.xlu2 %v1301_v3  ;;  %v2158_v3 = vld [vmem:[%s2899_s17 + $0x40] sm:$0xf]  ;;  %v2393_v53 = vld [vmem:[%s2871_s20 + $0x60] sm:$0xff] }
 0x4c0   : > { %v2159_v48 = vor.u32 %v2359_v45, %v2158_v3 }
 0x4c1   : > { %1557 = vmatpush.bf16.msra.mxu0 %v2231_v32  ;;  %1575 = vmatpush.bf16.msra.mxu1 %v2171_v54  ;;  %v2354_v32 = vld [vmem:[%s2899_s17 + $0x2c] sm:$0xf] }
 0x4c2   : > { %1533 = vmatpush.bf16.msrb.mxu2 %v2159_v48  ;;  %v2155_v2 = vor.u32 %v2354_v32, %v2152_v1  ;;  %1548 = vmatpush.bf16.msrb.mxu3 %v2147_v63  ;;  %v2388_v48 = vld [vmem:[%s2871_s20 + $0x38] sm:$0xff]  ;;  %v2383_v63 = vld [vmem:[%s2871_s20 + $0x10] sm:$0xff] }
 0x4c5   : > { %1558 = vmatpush.bf16.msra.mxu0 %v2215_v15  ;;  %1576 = vmatpush.bf16.msra.mxu1 %v2155_v2  ;;  %v2131_v15 = vor.u32 %v2349_v7, %v2128_v10  ;;  %v2382_v2 = vld [vmem:[%s2871_s20 + $0x8] sm:$0xff] }
 0x4c6   : > { %1534 = vmatpush.bf16.msrb.mxu2 %v2143_v58 }
 0x4c7   : > { %1549 = vmatpush.bf16.msrb.mxu3 %v2131_v15  ;;  %v2389_v15 = vld [vmem:[%s2871_s20 + $0x40] sm:$0xff] }
 0x4c9   : > { %1559 = vmatpush.bf16.msra.mxu0 %v2199_v26  ;;  %1577 = vmatpush.bf16.msra.mxu1 %v2139_v19 }
 0x4ca   : > { %1535 = vmatpush.bf16.msrb.mxu2 %v2127_v9 }
 0x4cb   : > { %1812 = vmatpush.bf16.msra.mxu3 %v2396_v49 }
 0x4cd   : > { %1560 = vmatpush.bf16.msra.mxu0 %v2183_v40 }
 0x4ce   : > { %1798 = vmatpush.bf16.msra.mxu2 %v2388_v48 }
 0x4cf   : > { %1813 = vmatpush.bf16.msra.mxu3 %v2395_v51 }
 0x4d1   : > { %1561 = vmatpush.bf16.msra.mxu0 %v2167_v52  ;;  %v2394_v52 = vld [vmem:[%s2871_s20 + $0x68] sm:$0xff] }
 0x4d2   : > { %1799 = vmatpush.bf16.msra.mxu2 %v2387_v50 }
 0x4d3   : > { %1814 = vmatpush.bf16.msra.mxu3 %v2394_v52 }
 0x4d5   : > { %1562 = vmatpush.bf16.msra.mxu0 %v2151_v0  ;;  %v2391_v0 = vld [vmem:[%s2871_s20 + $0x50] sm:$0xff] }
 0x4d6   : > { %1800 = vmatpush.bf16.msra.mxu2 %v2386_v47 }
 0x4d7   : > { %1815 = vmatpush.bf16.msra.mxu3 %v2393_v53 }
 0x4d9   : > { %1563 = vmatpush.bf16.msra.mxu0 %v2135_v16 }
 0x4da   : > { %1801 = vmatpush.bf16.msra.mxu2 %v2385_v5 }
 0x4db   : > { %1816 = vmatpush.bf16.msra.mxu3 %v2392_v57 }
 0x4de   : > { %1802 = vmatpush.bf16.msra.mxu2 %v2384_v56 }
 0x4df   : > { %1817 = vmatpush.bf16.msra.mxu3 %v2391_v0 }
 0x4e2   : > { %1803 = vmatpush.bf16.msra.mxu2 %v2383_v63 }
 0x4e3   : > { %1818 = vmatpush.bf16.msra.mxu3 %v2390_v4 }
 0x4e6   : > { %1804 = vmatpush.bf16.msra.mxu2 %v2382_v2 }
 0x4e7   : > { %1819 = vmatpush.bf16.msra.mxu3 %v2389_v15 }
 0x52a   : > { %v1303_v8 = vpop.xlane.xlu0 %1302 }
 0x52b   : > { %v1306_v14 = vmul.f32 %v1303_v8, %v2945_v59 }
 0x52d   : > { %v1308_v20 = vadd.f32 1e-06, %v1306_v14  ;;  %v2381_v14 = vld [vmem:[%s2871_s20] sm:$0xff] }
 0x52e   : > { %1805 = vmatpush.bf16.msra.mxu2 %v2381_v14 }
 0x52f   : > { %2526 = vrsqrt.f32 %v1308_v20  ;;  %vm1316_vm13 = vweird.f32 %v1308_v20 }
 0x532   : > { %v1305_v21 = vpop.xlane.xlu2 %1304 }
 0x533   : > { %v1307_v13 = vmul.f32 %v1305_v21, %v2945_v59 }
 0x535   : > { %v2527_v22 = vpop.eup %2526  ;;  %v1309_v23 = vadd.f32 1e-06, %v1307_v13 }
 0x536   : > { %v1311_v24 = vmul.f32 %v2527_v22, %v1308_v20  ;;  %vm1317_vm12 = vweird.f32 %v2527_v22 }
 0x537   : > { %2528 = vrsqrt.f32 %v1309_v23  ;;  %vm1318_vm14 = vmor %vm1316_vm13, %vm1317_vm12  ;;  %vm1326_vm0 = vweird.f32 %v1309_v23 }
 0x538   : > { %v1312_v25 = vmul.f32 %v2527_v22, %v1311_v24 }
 0x53a   : > { %v1313_v26 = vmul.f32 0.5, %v1312_v25 }
 0x53c   : > { %v1314_v27 = vsub.f32 1.5, %v1313_v26 }
 0x53d   : > { %v2529_v28 = vpop.eup %2528 }
 0x53e   : > { %v1321_v29 = vmul.f32 %v2529_v28, %v1309_v23  ;;  %v1315_v30 = vmul.f32 %v2527_v22, %v1314_v27  ;;  %vm1327_vm15 = vweird.f32 %v2529_v28 }
 0x53f   : > { %vm1328_vm1 = vmor %vm1326_vm0, %vm1327_vm15 }
 0x540   : > { %v1322_v31 = vmul.f32 %v2529_v28, %v1321_v29  ;;  %v1319_v38 = vsel %vm1318_vm14, %v2527_v22, %v1315_v30 }
 0x541   : > { %v1330_v40 = vmul.f32 %v1319_v38, %v3073_v37 }
 0x542   : > { %v1323_v35 = vmul.f32 0.5, %v1322_v31 }
 0x543   : > { %v1333_v3 = vmul.f32 %v1332_v41, %v1330_v40 }
 0x544   : > { %v1324_v33 = vsub.f32 1.5, %v1323_v35 }
 0x546   : > { %v1325_v39 = vmul.f32 %v2529_v28, %v1324_v33 }
 0x548   : > { %v1329_v42 = vsel %vm1328_vm1, %v2529_v28, %v1325_v39 }
 0x549   : > { %v1331_v43 = vmul.f32 %v1329_v42, %v3078_v44 }
 0x54b   : > { %v1334_v45 = vmul.f32 %v1332_v41, %v1331_v43 }
 0x54d   : > { %v1335_v46 = vpack.c.bf16 %v1334_v45, %v1333_v3 }
 0x54f   : > { %1536 = vmatmul.bf16.vlgmr.msrb.gmra.mxu2 %v1335_v46  ;;  %1550 = vmatmul.bf16.vlgmr.msrb.gmra.mxu3 %v1335_v46 }
 0x550   : > { %1564 = vmatmul.bf16.vlgmr.msra.gmra.mxu0 %v1335_v46  ;;  %1578 = vmatmul.bf16.vlgmr.msra.gmra.mxu1 %v1335_v46 }
 0x5cd   : > { %v1565_v35 = vpop.f32.mrf.mxu0  ;;  %v1579_v46 = vpop.f32.mrf.mxu1 }
 0x5d2   : > { %v3163_v54 = vpop.f32.mrf.mxu2  ;;  %v3165_v55 = vpop.f32.mrf.mxu3 }
 0x5d3   : > { %v1584_v58 = vsub.f32 0.0, %v3163_v54  ;;  %v1585_v60 = vsub.f32 0.0, %v3165_v55 }
 0x5d5   : > { %v1588_v61 = vmul.f32 1.442695, %v1584_v58  ;;  %v1590_v62 = vmul.f32 1.442695, %v1585_v60  ;;  %v1581_v14 = vpop.f32.mrf.mxu1 }
 0x5d7   : > { %2530 = vpow2.f32 %v1588_v61 }
 0x5d8   : > { %2532 = vpow2.f32 %v1590_v62 }
 0x5da   : > { %v3173_v32 = vpop.f32.mrf.mxu2  ;;  %v3175_v1 = vpop.f32.mrf.mxu3 }
 0x5db   : > { %v1586_v6 = vsub.f32 0.0, %v3173_v32  ;;  %v1587_v7 = vsub.f32 0.0, %v3175_v1 }
 0x5dd   : > { %v2531_v8 = vpop.eup %2530  ;;  %v1592_v9 = vmul.f32 1.442695, %v1586_v6  ;;  %v1594_v12 = vmul.f32 1.442695, %v1587_v7 }
 0x5de   : > { %v2533_v10 = vpop.eup %2532  ;;  %v1596_v11 = vadd.f32 1.0, %v2531_v8  ;;  %v1567_v8 = vpop.f32.mrf.mxu0 }
 0x5df   : > { %v1597_v16 = vadd.f32 1.0, %v2533_v10  ;;  %2534 = vpow2.f32 %v1592_v9 }
 0x5e0   : > { %2536 = vrcp.f32 %v1596_v11  ;;  %v1611_v30 = vand.u32 2147483648, %v1596_v11  ;;  %vm1605_vm3 = vweird.f32 %v1596_v11  ;;  %v1609_v31 = vand.u32 2147483647, %v1596_v11 }
 0x5e1   : > { %2538 = vrcp.f32 %v1597_v16  ;;  %v1624_v33 = vand.u32 2147483647, %v1597_v16  ;;  %v1626_v41 = vand.u32 2147483648, %v1597_v16  ;;  %vm1620_vm6 = vweird.f32 %v1597_v16 }
 0x5e2   : > { %2540 = vpow2.f32 %v1594_v12  ;;  %v1612_v43 = vor.u32 1.1754944e-38, %v1611_v30  ;;  %vm1610_vm7 = vcmp.eq.f32.partialorder %v1609_v31, 8.507059e+37 }
 0x5e3   : > { %vm1625_vm10 = vcmp.eq.f32.partialorder %v1624_v33, 8.507059e+37  ;;  %v1627_v5 = vor.u32 1.1754944e-38, %v1626_v41 }
 0x5e5   : > { %v2535_v17 = vpop.eup %2534 }
 0x5e6   : > { %v2537_v18 = vpop.eup %2536  ;;  %v1598_v19 = vadd.f32 1.0, %v2535_v17 }
 0x5e7   : > { %v2539_v20 = vpop.eup %2538  ;;  %v1601_v21 = vmul.f32 %v2537_v18, %v1596_v11  ;;  %vm1606_vm2 = vweird.f32 %v2537_v18 }
 0x5e8   : > { %v2541_v13 = vpop.eup %2540  ;;  %v1616_v22 = vmul.f32 %v2539_v20, %v1597_v16  ;;  %2542 = vrcp.f32 %v1598_v19  ;;  %vm3183_vm4 = vmor %vm1605_vm3, %vm1606_vm2  ;;  %vm1621_vm5 = vweird.f32 %v2539_v20  ;;  %v1641_v3 = vand.u32 2147483648, %v1598_v19 }
 0x5e9   : > { %v1602_v23 = vsub.f32 1.0, %v1601_v21  ;;  %v1599_v24 = vadd.f32 1.0, %v2541_v13  ;;  %vm3189_vm8 = vmor %vm1620_vm6, %vm1621_vm5  ;;  %v1639_v50 = vand.u32 2147483647, %v1598_v19  ;;  %vm1635_vm11 = vweird.f32 %v1598_v19 }
 0x5ea   : > { %v1617_v25 = vsub.f32 1.0, %v1616_v22  ;;  %v1642_v57 = vor.u32 1.1754944e-38, %v1641_v3 }
 0x5eb   : > { %v1603_v26 = vmul.f32 %v2537_v18, %v1602_v23  ;;  %2544 = vrcp.f32 %v1599_v24  ;;  %v1656_v56 = vand.u32 2147483648, %v1599_v24  ;;  %v1654_v60 = vand.u32 2147483647, %v1599_v24 }
 0x5ec   : > { %v1618_v27 = vmul.f32 %v2539_v20, %v1617_v25  ;;  %vm1640_vm14 = vcmp.eq.f32.partialorder %v1639_v50, 8.507059e+37  ;;  %vm1650_vm15 = vweird.f32 %v1599_v24 }
 0x5ed   : > { %v1604_v28 = vadd.f32 %v2537_v18, %v1603_v26  ;;  %v1657_v6 = vor.u32 1.1754944e-38, %v1656_v56  ;;  %vm1655_vm1 = vcmp.eq.f32.partialorder %v1654_v60, 8.507059e+37 }
 0x5ee   : > { %v2543_v29 = vpop.eup %2542  ;;  %v1619_v38 = vadd.f32 %v2539_v20, %v1618_v27 }
 0x5ef   : > { %v1631_v34 = vmul.f32 %v2543_v29, %v1598_v19  ;;  %v1608_v40 = vsel %vm3183_vm4, %v2537_v18, %v1604_v28  ;;  %vm1636_vm9 = vweird.f32 %v2543_v29 }
 0x5f0   : > { %v1613_v51 = vsel %vm1610_vm7, %v1612_v43, %v1608_v40  ;;  %v1623_v47 = vsel %vm3189_vm8, %v2539_v20, %v1619_v38  ;;  %vm1637_vm12 = vmor %vm1635_vm11, %vm1636_vm9 }
 0x5f1   : > { %v2545_v39 = vpop.eup %2544  ;;  %v1632_v42 = vsub.f32 1.0, %v1631_v34  ;;  %v1660_v61 = vmul.f32 %v1613_v51, %v3163_v54  ;;  %v1628_v62 = vsel %vm1625_vm10, %v1627_v5, %v1623_v47 }
 0x5f2   : > { %v1646_v45 = vmul.f32 %v2545_v39, %v1599_v24  ;;  %vm1651_vm13 = vweird.f32 %v2545_v39  ;;  %v1661_v7 = vmul.f32 %v1628_v62, %v3165_v55 }
 0x5f3   : > { %v1633_v49 = vmul.f32 %v2543_v29, %v1632_v42  ;;  %vm1652_vm0 = vmor %vm1650_vm15, %vm1651_vm13  ;;  %v1664_v10 = vmul.f32 %v1660_v61, %v1565_v35 }
 0x5f4   : > { %v1647_v52 = vsub.f32 1.0, %v1646_v45  ;;  %v1665_v16 = vmul.f32 %v1661_v7, %v1579_v46 }
 0x5f5   : > { %v1634_v53 = vadd.f32 %v2543_v29, %v1633_v49 }
 0x5f6   : > { %v1648_v58 = vmul.f32 %v2545_v39, %v1647_v52 }
 0x5f7   : > { %v1638_v63 = vsel %vm1637_vm12, %v2543_v29, %v1634_v53 }
 0x5f8   : > { %v1643_v0 = vsel %vm1640_vm14, %v1642_v57, %v1638_v63  ;;  %v1649_v2 = vadd.f32 %v2545_v39, %v1648_v58 }
 0x5f9   : > { %v1662_v4 = vmul.f32 %v1643_v0, %v3173_v32 }
 0x5fa   : > { %v1653_v9 = vsel %vm1652_vm0, %v2545_v39, %v1649_v2 }
 0x5fb   : > { %v1666_v11 = vmul.f32 %v1662_v4, %v1567_v8  ;;  %v1658_v12 = vsel %vm1655_vm1, %v1657_v6, %v1653_v9 }
 0x5fc   : > { %v1663_v54 = vmul.f32 %v1658_v12, %v3175_v1 }
 0x5fd   : > { %v1668_v15 = vpack.c.bf16 %v1666_v11, %v1664_v10 }
 0x5fe   : > { %v1667_v17 = vmul.f32 %v1663_v54, %v1581_v14 }
 0x5ff   : > { %1806 = vmatmul.bf16.vlgmr.msra.gmra.mxu2 %v1668_v15 }
 0x600   : > { %v1669_v18 = vpack.c.bf16 %v1667_v17, %v1665_v16 }
 0x602   : > { %1820 = vmatmul.bf16.vlgmr.msra.gmra.mxu3 %v1669_v18 }
 0x682   : > { %v1807_v32 = vpop.f32.mrf.mxu2 }
 0x683   : > { %v1808_v19 = vadd.f32 %v1807_v32, %v3073_v37 }
 0x685   : > { %v1821_v20 = vpop.f32.mrf.mxu3 }
 0x686   : > { %v1822_v55 = vadd.f32 %v1821_v20, %v1808_v19 }
 0x688   : > { %1826 = vst [vmem:[#allocation2] sm:$0xff] %v1822_v55 }
 0x68a   : > { %v1809_v21 = vpop.f32.mrf.mxu2 }
 0x68b   : > { %v1810_v13 = vadd.f32 %v1809_v21, %v3078_v44 }
 0x68c   : > { %1831 = sbr.rel (%p2316_p11) target bundleno = 1836 (0x72c), region = 84 }
 0x68d   : > { %v1823_v22 = vpop.f32.mrf.mxu3 }
 0x68e   : > { %v1824_v23 = vadd.f32 %v1823_v22, %v1810_v13 }
 0x690   : > { %1827 = vst [vmem:[#allocation2 + $0x8] sm:$0xff] %v1824_v23 }
 0x691   : > { %v1834_v1 = vmul.f32 %v1822_v55, %v1822_v55  ;;  %v1835_v24 = vmul.f32 %v1824_v23, %v1824_v23  ;;  %v1832_v33 = vld [vmem:[%s3266_s21] sm:$0x1] }
 0x692   : > { %v1833_v42 = vunpack.c.l.bf16 %v1832_v33 }
 0x693   : > { %1836 = vadd.xlane.f32.xlu0 %v1834_v1 }
 0x694   : > { %v1866_v46 = vperm.slane %v1833_v42, 0 }
 0x69b   : > { %1838 = vadd.xlane.f32.xlu0 %v1835_v24 }
 0x706   : > { %v1837_v25 = vpop.xlane.xlu0 %1836 }
 0x707   : > { %v1840_v26 = vmul.f32 %v1837_v25, %v2945_v59 }
 0x709   : > { %v1842_v37 = vadd.f32 1e-06, %v1840_v26 }
 0x70b   : > { %2546 = vrsqrt.f32 %v1842_v37  ;;  %vm1850_vm3 = vweird.f32 %v1842_v37 }
 0x70e   : > { %v1839_v27 = vpop.xlane.xlu0 %1838 }
 0x70f   : > { %v1841_v28 = vmul.f32 %v1839_v27, %v2945_v59 }
 0x711   : > { %v2547_v29 = vpop.eup %2546  ;;  %v1843_v44 = vadd.f32 1e-06, %v1841_v28 }
 0x712   : > { %v1845_v30 = vmul.f32 %v2547_v29, %v1842_v37  ;;  %vm1851_vm2 = vweird.f32 %v2547_v29 }
 0x713   : > { %2548 = vrsqrt.f32 %v1843_v44  ;;  %vm1852_vm4 = vmor %vm1850_vm3, %vm1851_vm2  ;;  %vm1860_vm6 = vweird.f32 %v1843_v44 }
 0x714   : > { %v1846_v31 = vmul.f32 %v2547_v29, %v1845_v30 }
 0x716   : > { %v1847_v34 = vmul.f32 0.5, %v1846_v31 }
 0x718   : > { %v1848_v35 = vsub.f32 1.5, %v1847_v34 }
 0x719   : > { %v2549_v36 = vpop.eup %2548 }
 0x71a   : > { %v1855_v38 = vmul.f32 %v2549_v36, %v1843_v44  ;;  %v1849_v39 = vmul.f32 %v2547_v29, %v1848_v35  ;;  %vm1861_vm5 = vweird.f32 %v2549_v36 }
 0x71b   : > { %vm1862_vm7 = vmor %vm1860_vm6, %vm1861_vm5 }
 0x71c   : > { %v1856_v40 = vmul.f32 %v2549_v36, %v1855_v38  ;;  %v1853_v59 = vsel %vm1852_vm4, %v2547_v29, %v1849_v39 }
 0x71d   : > { %v1864_v45 = vmul.f32 %v1853_v59, %v1822_v55 }
 0x71e   : > { %v1857_v41 = vmul.f32 0.5, %v1856_v40 }
 0x71f   : > { %v1867_v50 = vmul.f32 %v1866_v46, %v1864_v45 }
 0x720   : > { %v1858_v43 = vsub.f32 1.5, %v1857_v41 }
 0x722   : > { %v1859_v3 = vmul.f32 %v2549_v36, %v1858_v43 }
 0x724   : > { %v1863_v48 = vsel %vm1862_vm7, %v2549_v36, %v1859_v3 }
 0x725   : > { %v1865_v49 = vmul.f32 %v1863_v48, %v1824_v23 }
 0x727   : > { %v1868_v51 = vmul.f32 %v1866_v46, %v1865_v49 }
 0x729   : > { %v2404_v47 = vpack.c.bf16 %v1868_v51, %v1867_v50 }
 0x72b   : > { %2405 = vst [vmem:[#allocation8] sm:$0xff] %v2404_v47  }
 0x72c PF: > { %p2422_p2 = scmp.eq.s32.totalorder %s2778_s25, 1  ;;  %s2692_s16 = smov [#allocation8]  }
 0x72d   : > { %s1878_s27 = sshll.u32 %s2692_s16, 4  ;;  %s3267_s30 = sld [smem:[#allocation18_spill]]  ;;  %s1879_s27 = int_to_ptr.vmem [resolvable:$true] %s1878_s27 }
 0x72e   : > { %s2693_s23 = smov 4  }
 0x733   : > { %s1880_s19 = sshll.u32 %s3267_s30, 4  ;;  %s1881_s19 = int_to_ptr.hbm [resolvable:$true] %s1880_s19 }
 0x734   : > { %2411 = dma.vmem_to_hbm [thread:$0]  (%p2422_p2), %s1879_s27, 128, %s1881_s19, [#allocation5], %s2691_s13, %s2691_s13, %s2693_s23  }
 0x735   : > { %2663 = dma.done.wait (%p2422_p2), [#allocation5], 128  }
 0x736   : > { %2665 = vsyncadd (%p2422_p2), [#allocation5], 4294967168 }
 0x737 PF: > { %s3268_s24 = sld [smem:[#allocation13_spill]]  ;;  %s3271_s21 = smov %s2672_s22 }
 0x738   : > { %s3269_s3 = sld [smem:[#allocation12_spill]] }
 0x739   : > { %s3270_s23 = sld [smem:[#allocation14_spill]] }
 0x73d   : > { %p26_p3 = scmp.ge.s32.totalorder %s3268_s24, 4  }
 0x73e   : > { %s3272_s22 = smov %s3269_s3 }
 0x73f   :  { %28 = sbr.rel (!%p26_p3) target bundleno = 11 (0xb), region = 138 }
 0x744   :  { %1897 = vsyncpa [#allocation4], 1 }
 0x745   :  { %1899 = vsyncpa [#allocation4 + $0x1], 1 }
 0x746   :  { %1900 = vsyncpa [#allocation7], 1 }
 0x747   :  { %1902 = vsyncpa [#allocation7 + $0x1], 1 }
 0x748   :  { %1903 = vsyncpa [#allocation5], 1 }
 0x749   :  { %1905 = vsyncpa [#allocation5 + $0x1], 1 }

</bundles_post_ra>
